<compile_context>
chip_gen: v7x
topology: tpu7x:2x2x1
jax: 0.10.0
libtpu: 0.0.40
codegen_flags: <defaults>
</compile_context>

<pallas_src>
import functools

import jax
import jax.numpy as jnp
from jax.experimental import pallas as pl
from jax.experimental.pallas import tpu as pltpu

_LANE = 128


def _round_up(x, m):
    return (x + m - 1) // m * m


def _pad_axis(a, axis, target):
    if a.shape[axis] >= target:
        return a
    cfg = [(0, 0)] * a.ndim
    cfg[axis] = (0, target - a.shape[axis])
    return jnp.pad(a, cfg)


def _pick_tile_rows(Ho, Wo, target_rows):
    """Largest divisor of Ho whose (TH*Wo)-row matmul tile stays under target."""
    best = 1
    for d in range(1, Ho + 1):
        if Ho % d == 0 and d * Wo <= target_rows:
            best = d
    return best


# ----------------------------------------------------------------------------
# Pass 1: conv (im2col matmul on the MXU) + per-tile partial BN statistics
# ----------------------------------------------------------------------------
def _conv_stats_kernel(x_hbm, w_ref, conv_ref, stats_ref, xtile_ref, copy_sem,
                       *, stride, TH, Wo, Wp, Cin_p, IN_TH, Cout_tot):
    n = pl.program_id(0)
    h = pl.program_id(1)
    row0 = h * (TH * stride)            # first padded-input row of this tile

    # Halo DMA: overlapping row windows can't be expressed with Blocked
    # BlockSpecs, so the padded input stays in HBM and the (IN_TH, Wp, Cin_p)
    # window for this tile is copied explicitly.
    cp = pltpu.make_async_copy(
        x_hbm.at[n, pl.ds(row0, IN_TH), :, :], xtile_ref, copy_sem.at[0])
    cp.start()
    cp.wait()
    xt = xtile_ref[...]

    acc = jnp.zeros((TH * Wo, Cout_tot), jnp.float32)
    for kh in range(3):
        rows = jax.lax.slice(
            xt, (kh, 0, 0),
            (kh + stride * (TH - 1) + 1, Wp, Cin_p),
            (stride, 1, 1))                                  # (TH, Wp, Cin_p)
        # TODO(synk): stride>1 uses strided lax.slice; only stride==1 is
        # exercised by the tests below.
        taps = []
        for kw in range(3):
            taps.append(jax.lax.slice(
                rows, (0, kw, 0),
                (TH, kw + stride * (Wo - 1) + 1, Cin_p),
                (1, stride, 1)))                             # (TH, Wo, Cin_p)
        # Fuse the 3 kw taps along the contraction dim: one K = 3*Cin_p matmul
        # per kh; main+skip outputs share the same patch via the fused slab.
        patch = jnp.concatenate(taps, axis=-1).reshape(TH * Wo, 3 * Cin_p)
        acc = acc + jnp.dot(patch, w_ref[kh],
                            preferred_element_type=jnp.float32)
    # NOTE: the conv bias is intentionally omitted -- training-mode BatchNorm
    # subtracts the batch mean, which cancels any per-channel constant exactly.

    conv_ref[...] = acc.reshape(1, TH, Wo, Cout_tot).astype(conv_ref.dtype)

    # Per-tile partial statistics; the tiny cross-tile reduction happens in the
    # wrapper so both grid axes stay "parallel" (megacore-friendly).
    s1 = jnp.sum(acc, axis=0, keepdims=True)
    s2 = jnp.sum(acc * acc, axis=0, keepdims=True)
    pad = jnp.zeros((6, Cout_tot), jnp.float32)
    stats_ref[...] = jnp.concatenate([s1, s2, pad], axis=0).reshape(
        1, 1, 8, Cout_tot)


# ----------------------------------------------------------------------------
# Pass 2: BN normalize + residual add + ReLU
# ----------------------------------------------------------------------------
def _bn_add_relu_skipconv_kernel(conv_ref, scale_ref, shift_ref, out_ref, *,
                                 Cout_p):
    scale = scale_ref[...].reshape(1, 1, 1, -1)
    shift = shift_ref[...].reshape(1, 1, 1, -1)
    y = conv_ref[...] * scale + shift                 # (1, TH, Wo, 2*Cout_p)
    out = jnp.maximum(y[..., :Cout_p] + y[..., Cout_p:], 0.0)
    out_ref[...] = out.astype(out_ref.dtype)


def _bn_add_relu_identity_kernel(xpad_hbm, conv_ref, scale_ref, shift_ref,
                                 out_ref, xc_ref, copy_sem, *, TH, Wo, Cin_p):
    n = pl.program_id(0)
    h = pl.program_id(1)
    # Residual = center window of the already-materialized padded input
    # (avoids a second HBM copy of x on the identity-skip path).
    cp = pltpu.make_async_copy(
        xpad_hbm.at[n, pl.ds(1 + h * TH, TH), pl.ds(1, Wo), :],
        xc_ref, copy_sem.at[0])
    cp.start()
    cp.wait()
    scale = scale_ref[...].reshape(1, 1, 1, -1)
    shift = shift_ref[...].reshape(1, 1, 1, -1)
    y = conv_ref[...] * scale + shift                 # (1, TH, Wo, Cout_p)
    resid = xc_ref[...].astype(jnp.float32).reshape(1, TH, Wo, Cin_p)
    out_ref[...] = jnp.maximum(y + resid, 0.0).astype(out_ref.dtype)


# ----------------------------------------------------------------------------
# Wrapper (NCHW in / NCHW out, like the PyTorch module)
# ----------------------------------------------------------------------------
def basic_block_forward(x_nchw, params, *, stride, eps=1e-5,
                        compute_dtype=jnp.float32, tile_rows_target=512):
    N, Cin, H, W = x_nchw.shape
    w_main = params["w_main"]                             # (3, 3, Cin, Cout)
    Cout = w_main.shape[-1]
    has_skip_conv = (stride != 1) or (Cin != Cout)

    Ho = (H + 2 - 3) // stride + 1
    Wo = (W + 2 - 3) // stride + 1
    Hp, Wp = H + 2, W + 2
    Cin_p = _round_up(Cin, _LANE)                         # lane-dense channels
    Cout_p = _round_up(Cout, _LANE)
    Cout_tot = 2 * Cout_p if has_skip_conv else Cout_p    # main [+ skip] slab

    # --- activations: NCHW -> NHWC, channel pad, 1-px spatial halo pad ------
    x = jnp.transpose(x_nchw, (0, 2, 3, 1)).astype(jnp.float32)
    x = _pad_axis(x, 3, Cin_p)
    x_pad = jnp.pad(x, ((0, 0), (1, 1), (1, 1), (0, 0))).astype(compute_dtype)
    # TODO(synk): the halo could be synthesized in-kernel (masked edge DMAs)
    # to avoid this one extra HBM copy of the input.

    # --- weights / BN affine: pad channels, fuse main+skip along Cout, and
    #     lay out as (kh, kw*Cin_p, Cout_tot) to match the kw-fused patches ---
    def _prep_w(w):
        return _pad_axis(_pad_axis(w, 2, Cin_p), 3, Cout_p)

    w_all = _prep_w(w_main)
    gamma = _pad_axis(params["gamma_main"].astype(jnp.float32), 0, Cout_p)
    beta = _pad_axis(params["beta_main"].astype(jnp.float32), 0, Cout_p)
    if has_skip_conv:
        w_all = jnp.concatenate([w_all, _prep_w(params["w_skip"])], axis=3)
        gamma = jnp.concatenate(
            [gamma, _pad_axis(params["gamma_skip"].astype(jnp.float32), 0, Cout_p)])
        beta = jnp.concatenate(
            [beta, _pad_axis(params["beta_skip"].astype(jnp.float32), 0, Cout_p)])
    w_all = w_all.reshape(3, 3 * Cin_p, Cout_tot).astype(compute_dtype)

    # --- tiling over output rows --------------------------------------------
    TH = _pick_tile_rows(Ho, Wo, tile_rows_target)
    num_h = Ho // TH
    IN_TH = stride * (TH - 1) + 3                         # halo'd input rows
    grid = (N, num_h)

    itemsize = jnp.dtype(compute_dtype).itemsize
    vmem_est = (2 * IN_TH * Wp * Cin_p * itemsize         # input tile
                + 2 * 3 * 3 * Cin_p * Cout_tot * itemsize  # weights
                + 3 * TH * Wo * 3 * Cin_p * itemsize       # im2col patches
                + 4 * TH * Wo * Cout_tot * 4               # acc + conv tile
                + 4 * 8 * Cout_tot * 4)                    # stats
    vmem_limit = int(min(max(4 * vmem_est, 32 * 2**20), 48 * 2**20))
    cparams = pltpu.CompilerParams(
        dimension_semantics=("parallel", "parallel"),
        vmem_limit_bytes=vmem_limit)

    # --- pass 1: conv + partial BN stats -------------------------------------
    conv_out, stats = pl.pallas_call(
        functools.partial(_conv_stats_kernel, stride=stride, TH=TH, Wo=Wo,
                          Wp=Wp, Cin_p=Cin_p, IN_TH=IN_TH, Cout_tot=Cout_tot),
        out_shape=(jax.ShapeDtypeStruct((N, Ho, Wo, Cout_tot), jnp.float32),
                   jax.ShapeDtypeStruct((N, num_h, 8, Cout_tot), jnp.float32)),
        grid=grid,
        in_specs=[pl.BlockSpec(memory_space=pl.ANY),      # x_pad stays in HBM
                  pl.BlockSpec((3, 3 * Cin_p, Cout_tot),
                               lambda n, h: (0, 0, 0))],
        out_specs=(pl.BlockSpec((1, TH, Wo, Cout_tot),
                                lambda n, h: (n, h, 0, 0)),
                   pl.BlockSpec((1, 1, 8, Cout_tot),
                                lambda n, h: (n, h, 0, 0))),
        scratch_shapes=[pltpu.VMEM((IN_TH, Wp, Cin_p), compute_dtype),
                        pltpu.SemaphoreType.DMA((1,))],
        compiler_params=cparams,
    )(x_pad, w_all)

    # --- finalize batch statistics (tiny per-channel math, plain XLA) --------
    m_total = float(N * Ho * Wo)
    s1 = jnp.sum(stats[:, :, 0, :], axis=(0, 1))
    s2 = jnp.sum(stats[:, :, 1, :], axis=(0, 1))
    mean = s1 / m_total
    # TODO(synk): E[x^2]-E[x]^2 in f32 can cancel for very large-mean conv
    # outputs; a second reduction pass (E[(x-mean)^2]) would be exact.
    var = jnp.maximum(s2 / m_total - mean * mean, 0.0)    # biased, like torch
    inv = jax.lax.rsqrt(var + eps)
    scale = (gamma * inv).reshape(1, Cout_tot)
    shift = (beta - gamma * inv * mean).reshape(1, Cout_tot)

    # --- pass 2: normalize + residual + ReLU ----------------------------------
    if has_skip_conv:
        out_nhwc = pl.pallas_call(
            functools.partial(_bn_add_relu_skipconv_kernel, Cout_p=Cout_p),
            out_shape=jax.ShapeDtypeStruct((N, Ho, Wo, Cout_p), jnp.float32),
            grid=grid,
            in_specs=[pl.BlockSpec((1, TH, Wo, Cout_tot),
                                   lambda n, h: (n, h, 0, 0)),
                      pl.BlockSpec((1, Cout_tot), lambda n, h: (0, 0)),
                      pl.BlockSpec((1, Cout_tot), lambda n, h: (0, 0))],
            out_specs=pl.BlockSpec((1, TH, Wo, Cout_p),
                                   lambda n, h: (n, h, 0, 0)),
            compiler_params=cparams,
        )(conv_out, scale, shift)
    else:
        out_nhwc = pl.pallas_call(
            functools.partial(_bn_add_relu_identity_kernel, TH=TH, Wo=Wo,
                              Cin_p=Cin_p),
            out_shape=jax.ShapeDtypeStruct((N, Ho, Wo, Cout_p), jnp.float32),
            grid=grid,
            in_specs=[pl.BlockSpec(memory_space=pl.ANY),  # x_pad (residual)
                      pl.BlockSpec((1, TH, Wo, Cout_tot),
                                   lambda n, h: (n, h, 0, 0)),
                      pl.BlockSpec((1, Cout_tot), lambda n, h: (0, 0)),
                      pl.BlockSpec((1, Cout_tot), lambda n, h: (0, 0))],
            out_specs=pl.BlockSpec((1, TH, Wo, Cout_p),
                                   lambda n, h: (n, h, 0, 0)),
            scratch_shapes=[pltpu.VMEM((TH, Wo, Cin_p), compute_dtype),
                            pltpu.SemaphoreType.DMA((1,))],
            compiler_params=cparams,
        )(x_pad, conv_out, scale, shift)

    out = out_nhwc[..., :Cout]                            # drop lane padding
    return jnp.transpose(out, (0, 3, 1, 2))               # back to NCHW


# ----------------------------------------------------------------------------
# Plain-JAX reference (verification only) and parameter construction
# ----------------------------------------------------------------------------
def _ref_conv_bn(x_nhwc, w_hwio, b, gamma, beta, stride, eps):
    y = jax.lax.conv_general_dilated(
        x_nhwc, w_hwio, window_strides=(stride, stride),
        padding=[(1, 1), (1, 1)],
        dimension_numbers=("NHWC", "HWIO", "NHWC"))
    y = y + b.reshape(1, 1, 1, -1)
    mean = jnp.mean(y, axis=(0, 1, 2), keepdims=True)
    var = jnp.mean((y - mean) ** 2, axis=(0, 1, 2), keepdims=True)
    return (y - mean) / jnp.sqrt(var + eps) * gamma.reshape(1, 1, 1, -1) \
        + beta.reshape(1, 1, 1, -1)


def reference_forward(x_nchw, params, *, stride, eps=1e-5):
    x = jnp.transpose(x_nchw, (0, 2, 3, 1)).astype(jnp.float32)
    Cin = x.shape[-1]
    Cout = params["w_main"].shape[-1]
    main = _ref_conv_bn(x, params["w_main"], params["b_main"],
                        params["gamma_main"], params["beta_main"], stride, eps)
    if stride != 1 or Cin != Cout:
        skip = _ref_conv_bn(x, params["w_skip"], params["b_skip"],
                            params["gamma_skip"], params["beta_skip"],
                            stride, eps)
    else:
        skip = x
    out = jax.nn.relu(main + skip)
    return jnp.transpose(out, (0, 3, 1, 2))


def _make_params(key, Cin, Cout, with_skip):
    ks = jax.random.split(key, 8)
    p = {
        "w_main": 0.2 * jax.random.normal(ks[0], (3, 3, Cin, Cout), jnp.float32),
        "b_main": 0.1 * jax.random.normal(ks[1], (Cout,), jnp.float32),
        "gamma_main": 1.0 + 0.1 * jax.random.normal(ks[2], (Cout,), jnp.float32),
        "beta_main": 0.1 * jax.random.normal(ks[3], (Cout,), jnp.float32),
    }
    if with_skip:
        p.update({
            "w_skip": 0.2 * jax.random.normal(ks[4], (3, 3, Cin, Cout), jnp.float32),
            "b_skip": 0.1 * jax.random.normal(ks[5], (Cout,), jnp.float32),
            "gamma_skip": 1.0 + 0.1 * jax.random.normal(ks[6], (Cout,), jnp.float32),
            "beta_skip": 0.1 * jax.random.normal(ks[7], (Cout,), jnp.float32),
        })
    return p


if __name__ == "__main__":
    key = jax.random.PRNGKey(0)
    kx, kp1, kp2 = jax.random.split(key, 3)

    N, Cin, H, W, Cout = 2, 4, 16, 16, 8
    x = jax.random.normal(kx, (N, Cin, H, W), jnp.float32)

    # Case 1: Cin != Cout -> skip path is Conv+BN (stride=1); small row tiles
    # to exercise the multi-tile grid, halo DMA offsets and stats reduction.
    params = _make_params(kp1, Cin, Cout, with_skip=True)
    out = jax.block_until_ready(
        basic_block_forward(x, params, stride=1, tile_rows_target=64))
    ref = reference_forward(x, params, stride=1)
    assert out.shape == (N, Cout, H, W)
    assert jnp.allclose(out, ref, atol=1e-4, rtol=1e-4), \
        float(jnp.max(jnp.abs(out - ref)))

    # Case 2: identity skip (Cin == Cout, stride == 1), default tiling.
    params_id = _make_params(kp2, Cin, Cin, with_skip=False)
    out_id = jax.block_until_ready(basic_block_forward(x, params_id, stride=1))
    ref_id = reference_forward(x, params_id, stride=1)
    assert out_id.shape == (N, Cin, H, W)
    assert jnp.allclose(out_id, ref_id, atol=1e-4, rtol=1e-4), \
        float(jnp.max(jnp.abs(out_id - ref_id)))

    # Case 3: bf16 MXU path (performance dtype) -- loose tolerance vs f32 ref.
    out_bf = jax.block_until_ready(
        basic_block_forward(x, params, stride=1, compute_dtype=jnp.bfloat16,
                            tile_rows_target=64))
    assert jnp.allclose(out_bf, ref, atol=1e-1, rtol=1e-1), \
        float(jnp.max(jnp.abs(out_bf - ref)))

    print("KERNEL_OK")
</pallas_src>

<mosaic_0001>
module attributes {stable_mosaic.version = 11 : i64} {
  func.func @_conv_stats_kernel(%arg0: i32, %arg1: i32, %arg2: memref<2x18x18x128xf32, #tpu.memory_space<any>>, %arg3: memref<3x384x256xf32, #tpu.memory_space<vmem>>, %arg4: memref<1x4x16x256xf32, #tpu.memory_space<vmem>>, %arg5: memref<1x1x8x256xf32, #tpu.memory_space<vmem>>, %arg6: memref<6x18x128xf32, #tpu.memory_space<vmem>>, %arg7: memref<1x!tpu.dma_semaphore, #tpu.memory_space<semaphore_mem>>) attributes {dimension_semantics = [#tpu.dimension_semantics<parallel>, #tpu.dimension_semantics<parallel>], iteration_bounds = array<i64: 2, 4>, scalar_prefetch = 0 : i64, scratch_operands = 2 : i64, tpu.core_type = #tpu.core_type<tc>, window_params = [{}, {pipeline_mode = #tpu.pipeline_mode<synchronous>, transform_indices = @transform_1, window_bounds = array<i64: 3, 384, 256>}, {transform_indices = @transform_2, window_bounds = array<i64: 1, 4, 16, 256>}, {transform_indices = @transform_3, window_bounds = array<i64: 1, 1, 8, 256>}]} {
    %c4_i32 = arith.constant 4 : i32
    %0 = arith.muli %arg1, %c4_i32 : i32
    %c0_i32 = arith.constant 0 : i32
    %c0_i32_0 = arith.constant 0 : i32
    %c0_i32_1 = arith.constant 0 : i32
    %1 = tpu.memref_slice %arg2[%arg0, %0, %c0_i32_0, %c0_i32_1] : memref<2x18x18x128xf32, #tpu.memory_space<any>> -> memref<1x6x18x128xf32, #tpu.memory_space<any>>
    %2 = tpu.memref_squeeze %1 : memref<1x6x18x128xf32, #tpu.memory_space<any>> -> memref<6x18x128xf32, #tpu.memory_space<any>>
    %3 = tpu.memref_slice %arg7[%c0_i32] : memref<1x!tpu.dma_semaphore, #tpu.memory_space<semaphore_mem>> -> memref<1x!tpu.dma_semaphore, #tpu.memory_space<semaphore_mem>>
    %4 = tpu.memref_squeeze %3 : memref<1x!tpu.dma_semaphore, #tpu.memory_space<semaphore_mem>> -> memref<!tpu.dma_semaphore, #tpu.memory_space<semaphore_mem>>
    tpu.enqueue_dma source(%2 : memref<6x18x128xf32, #tpu.memory_space<any>>) target(%arg6 : memref<6x18x128xf32, #tpu.memory_space<vmem>>) target_semaphore(%4 : memref<!tpu.dma_semaphore, #tpu.memory_space<semaphore_mem>>)
    %c0_i32_2 = arith.constant 0 : i32
    %c0_i32_3 = arith.constant 0 : i32
    %c0_i32_4 = arith.constant 0 : i32
    %5 = tpu.memref_slice %arg2[%arg0, %0, %c0_i32_3, %c0_i32_4] : memref<2x18x18x128xf32, #tpu.memory_space<any>> -> memref<1x6x18x128xf32, #tpu.memory_space<any>>
    %6 = tpu.memref_squeeze %5 : memref<1x6x18x128xf32, #tpu.memory_space<any>> -> memref<6x18x128xf32, #tpu.memory_space<any>>
    %7 = tpu.memref_slice %arg7[%c0_i32_2] : memref<1x!tpu.dma_semaphore, #tpu.memory_space<semaphore_mem>> -> memref<1x!tpu.dma_semaphore, #tpu.memory_space<semaphore_mem>>
    %8 = tpu.memref_squeeze %7 : memref<1x!tpu.dma_semaphore, #tpu.memory_space<semaphore_mem>> -> memref<!tpu.dma_semaphore, #tpu.memory_space<semaphore_mem>>
    tpu.wait_dma2 semaphore(%8 : memref<!tpu.dma_semaphore, #tpu.memory_space<semaphore_mem>>) src(%6 : memref<6x18x128xf32, #tpu.memory_space<any>>) dst(%arg6 : memref<6x18x128xf32, #tpu.memory_space<vmem>>)
    %c0 = arith.constant 0 : index
    %c0_5 = arith.constant 0 : index
    %c0_6 = arith.constant 0 : index
    %9 = vector.load %arg6[%c0, %c0_5, %c0_6] : memref<6x18x128xf32, #tpu.memory_space<vmem>>, vector<6x18x128xf32>
    %cst = arith.constant 0.000000e+00 : f32
    %10 = vector.broadcast %cst : f32 to vector<64x256xf32>
    %11 = vector.extract_strided_slice %9 {offsets = [0, 0, 0], sizes = [4, 18, 128], strides = [1, 1, 1]} : vector<6x18x128xf32> to vector<4x18x128xf32>
    %12 = vector.extract_strided_slice %11 {offsets = [0, 0, 0], sizes = [4, 16, 128], strides = [1, 1, 1]} : vector<4x18x128xf32> to vector<4x16x128xf32>
    %13 = vector.extract_strided_slice %11 {offsets = [0, 1, 0], sizes = [4, 16, 128], strides = [1, 1, 1]} : vector<4x18x128xf32> to vector<4x16x128xf32>
    %14 = vector.extract_strided_slice %11 {offsets = [0, 2, 0], sizes = [4, 16, 128], strides = [1, 1, 1]} : vector<4x18x128xf32> to vector<4x16x128xf32>
    %15 = tpu.concatenate %12, %13, %14 in 2 : vector<4x16x128xf32>, vector<4x16x128xf32>, vector<4x16x128xf32> -> vector<4x16x384xf32>
    %16 = vector.shape_cast %15 : vector<4x16x384xf32> to vector<64x384xf32>
    %c0_7 = arith.constant 0 : index
    %c0_8 = arith.constant 0 : index
    %c0_9 = arith.constant 0 : index
    %17 = vector.load %arg3[%c0_7, %c0_8, %c0_9] : memref<3x384x256xf32, #tpu.memory_space<vmem>>, vector<1x384x256xf32>
    %18 = vector.shape_cast %17 : vector<1x384x256xf32> to vector<384x256xf32>
    %cst_10 = arith.constant dense<0.000000e+00> : vector<64x256xf32>
    %19 = tpu.matmul %16, %18, %cst_10 {dimension_numbers = #tpu.dot_dimension_numbers<[1], [0], [0], [1], [0, 0, 1, 1], [], []>} : vector<64x384xf32>, vector<384x256xf32>, vector<64x256xf32> -> vector<64x256xf32>
    %20 = arith.addf %10, %19 : vector<64x256xf32>
    %21 = vector.extract_strided_slice %9 {offsets = [1, 0, 0], sizes = [4, 18, 128], strides = [1, 1, 1]} : vector<6x18x128xf32> to vector<4x18x128xf32>
    %22 = vector.extract_strided_slice %21 {offsets = [0, 0, 0], sizes = [4, 16, 128], strides = [1, 1, 1]} : vector<4x18x128xf32> to vector<4x16x128xf32>
    %23 = vector.extract_strided_slice %21 {offsets = [0, 1, 0], sizes = [4, 16, 128], strides = [1, 1, 1]} : vector<4x18x128xf32> to vector<4x16x128xf32>
    %24 = vector.extract_strided_slice %21 {offsets = [0, 2, 0], sizes = [4, 16, 128], strides = [1, 1, 1]} : vector<4x18x128xf32> to vector<4x16x128xf32>
    %25 = tpu.concatenate %22, %23, %24 in 2 : vector<4x16x128xf32>, vector<4x16x128xf32>, vector<4x16x128xf32> -> vector<4x16x384xf32>
    %26 = vector.shape_cast %25 : vector<4x16x384xf32> to vector<64x384xf32>
    %c1 = arith.constant 1 : index
    %c0_11 = arith.constant 0 : index
    %c0_12 = arith.constant 0 : index
    %27 = vector.load %arg3[%c1, %c0_11, %c0_12] : memref<3x384x256xf32, #tpu.memory_space<vmem>>, vector<1x384x256xf32>
    %28 = vector.shape_cast %27 : vector<1x384x256xf32> to vector<384x256xf32>
    %cst_13 = arith.constant dense<0.000000e+00> : vector<64x256xf32>
    %29 = tpu.matmul %26, %28, %cst_13 {dimension_numbers = #tpu.dot_dimension_numbers<[1], [0], [0], [1], [0, 0, 1, 1], [], []>} : vector<64x384xf32>, vector<384x256xf32>, vector<64x256xf32> -> vector<64x256xf32>
    %30 = arith.addf %20, %29 : vector<64x256xf32>
    %31 = vector.extract_strided_slice %9 {offsets = [2, 0, 0], sizes = [4, 18, 128], strides = [1, 1, 1]} : vector<6x18x128xf32> to vector<4x18x128xf32>
    %32 = vector.extract_strided_slice %31 {offsets = [0, 0, 0], sizes = [4, 16, 128], strides = [1, 1, 1]} : vector<4x18x128xf32> to vector<4x16x128xf32>
    %33 = vector.extract_strided_slice %31 {offsets = [0, 1, 0], sizes = [4, 16, 128], strides = [1, 1, 1]} : vector<4x18x128xf32> to vector<4x16x128xf32>
    %34 = vector.extract_strided_slice %31 {offsets = [0, 2, 0], sizes = [4, 16, 128], strides = [1, 1, 1]} : vector<4x18x128xf32> to vector<4x16x128xf32>
    %35 = tpu.concatenate %32, %33, %34 in 2 : vector<4x16x128xf32>, vector<4x16x128xf32>, vector<4x16x128xf32> -> vector<4x16x384xf32>
    %36 = vector.shape_cast %35 : vector<4x16x384xf32> to vector<64x384xf32>
    %c2 = arith.constant 2 : index
    %c0_14 = arith.constant 0 : index
    %c0_15 = arith.constant 0 : index
    %37 = vector.load %arg3[%c2, %c0_14, %c0_15] : memref<3x384x256xf32, #tpu.memory_space<vmem>>, vector<1x384x256xf32>
    %38 = vector.shape_cast %37 : vector<1x384x256xf32> to vector<384x256xf32>
    %cst_16 = arith.constant dense<0.000000e+00> : vector<64x256xf32>
    %39 = tpu.matmul %36, %38, %cst_16 {dimension_numbers = #tpu.dot_dimension_numbers<[1], [0], [0], [1], [0, 0, 1, 1], [], []>} : vector<64x384xf32>, vector<384x256xf32>, vector<64x256xf32> -> vector<64x256xf32>
    %40 = arith.addf %30, %39 : vector<64x256xf32>
    %41 = vector.shape_cast %40 : vector<64x256xf32> to vector<1x4x16x256xf32>
    %c0_17 = arith.constant 0 : index
    %c0_18 = arith.constant 0 : index
    %c0_19 = arith.constant 0 : index
    %c0_20 = arith.constant 0 : index
    %42 = vector.load %arg4[%c0_17, %c0_18, %c0_19, %c0_20] : memref<1x4x16x256xf32, #tpu.memory_space<vmem>>, vector<1x4x16x256xf32>
    tpu.vector_store %arg4[%c0_17, %c0_18, %c0_19, %c0_20], %41 {strides = array<i32>} : memref<1x4x16x256xf32, #tpu.memory_space<vmem>>, vector<1x4x16x256xf32>,
    %cst_21 = arith.constant dense<0.000000e+00> : vector<256xf32>
    %43 = vector.multi_reduction <add>, %40, %cst_21 [0] : vector<64x256xf32> to vector<256xf32>
    %44 = vector.shape_cast %43 : vector<256xf32> to vector<1x256xf32>
    %45 = arith.mulf %40, %40 : vector<64x256xf32>
    %cst_22 = arith.constant dense<0.000000e+00> : vector<256xf32>
    %46 = vector.multi_reduction <add>, %45, %cst_22 [0] : vector<64x256xf32> to vector<256xf32>
    %47 = vector.shape_cast %46 : vector<256xf32> to vector<1x256xf32>
    %cst_23 = arith.constant 0.000000e+00 : f32
    %48 = vector.broadcast %cst_23 : f32 to vector<6x256xf32>
    %49 = tpu.concatenate %44, %47, %48 in 0 : vector<1x256xf32>, vector<1x256xf32>, vector<6x256xf32> -> vector<8x256xf32>
    %50 = vector.shape_cast %49 : vector<8x256xf32> to vector<1x1x8x256xf32>
    %c0_24 = arith.constant 0 : index
    %c0_25 = arith.constant 0 : index
    %c0_26 = arith.constant 0 : index
    %c0_27 = arith.constant 0 : index
    %51 = vector.load %arg5[%c0_24, %c0_25, %c0_26, %c0_27] : memref<1x1x8x256xf32, #tpu.memory_space<vmem>>, vector<1x1x8x256xf32>
    tpu.vector_store %arg5[%c0_24, %c0_25, %c0_26, %c0_27], %50 {strides = array<i32>} : memref<1x1x8x256xf32, #tpu.memory_space<vmem>>, vector<1x1x8x256xf32>,
    return
  }
  func.func @transform_1(%arg0: i32, %arg1: i32) -> (i32, i32, i32) {
    %c0_i32 = arith.constant 0 : i32
    %c0_i32_0 = arith.constant 0 : i32
    %c0_i32_1 = arith.constant 0 : i32
    %c0_i32_2 = arith.constant 0 : i32
    return %c0_i32, %c0_i32_0, %c0_i32_1 : i32, i32, i32
  }
  func.func @transform_2(%arg0: i32, %arg1: i32) -> (i32, i32, i32, i32) {
    %c0_i32 = arith.constant 0 : i32
    %c0_i32_0 = arith.constant 0 : i32
    %c0_i32_1 = arith.constant 0 : i32
    return %arg0, %arg1, %c0_i32, %c0_i32_0 : i32, i32, i32, i32
  }
  func.func @transform_3(%arg0: i32, %arg1: i32) -> (i32, i32, i32, i32) {
    %c0_i32 = arith.constant 0 : i32
    %c0_i32_0 = arith.constant 0 : i32
    %c0_i32_1 = arith.constant 0 : i32
    return %arg0, %arg1, %c0_i32, %c0_i32_0 : i32, i32, i32, i32
  }
}

</mosaic_0001>

<bundles_post_ra>
// kernel: tpu_custom_call.1
= control target key start
LH: loop header
LB: loop body
LE: loop exit
PB: predicated region body
PF: predicated region fallthrough
CT: control target
= control target key end

     0   :  { %9 = vsyncpa [#allocation5], 0  ;;  %s2886_s0 = inlined_call_operand.vmem [shape: f32[2,18,18,128], index: 0, kind: input, shape index: {}]   ;;  %s2887_s1 = inlined_call_operand.hbm [shape: f32[3,384,256], index: 1, kind: input, shape index: {}]   ;;  %s2888_s2 = inlined_call_operand.hbm [shape: f32[2,16,16,256], index: 2, kind: output, shape index: {0}]   ;;  %s2889_s3 = inlined_call_operand.hbm [shape: f32[2,4,8,256], index: 3, kind: output, shape index: {1}]  }
   0x1   :  { %10 = vsyncpa [#allocation6], 0 }
   0x2   :  { %12 = vsyncpa [#allocation6 + $0x1], 0 }
   0x3   :  { %13 = vsyncpa [#allocation9], 0 }
   0x4   :  { %15 = vsyncpa [#allocation9 + $0x1], 0  ;;  %s2343_s12 = smov 0   ;;  %s2345_s13 = smov 0  }
   0x5   :  { %s2347_s14 = smov 0   ;;  %s2349_s15 = smov 0  }
   0x6   :  { %s2351_s16 = smov 0   ;;  %s2353_s17 = smov 0  }
   0x7   :  { %s2355_s18 = smov 0   ;;  %s2357_s19 = smov 0  }
   0x8 LB: > { %s1642_s20 = sadd.s32 4294967295, %s2313_s19   ;;  %s1643_s21 = sadd.s32 4294967294, %s2313_s19   ;;  %s2313_s19 = sphi %s2357_s19, %s21_s19   ;;  %s2309_s18 = sphi %s2355_s18, %s2909_s18   ;;  %s2305_s17 = sphi %s2353_s17, %s2908_s17   ;;  %s2301_s16 = sphi %s2351_s16, %s2907_s16   ;;  %s2297_s15 = sphi %s2349_s15, %s2906_s15   ;;  %s2293_s14 = sphi %s2347_s14, %s2905_s14   ;;  %s2289_s13 = sphi %s2345_s13, %s2904_s13   ;;  %s2285_s12 = sphi %s2343_s12, %s2903_s12  }
   0x9   : > { %s30_s22 = sadd.s32 1, %s2305_s17  ;;  %s33_s23 = sadd.s32 1, %s2309_s18 }
   0xa   : > { %p31_p0 = scmp.ge.s32.totalorder %s30_s22, 4  ;;  %s63_s24 = sadd.s32 1, %s2293_s14 }
   0xb   : > { %p73_p1 = scmp.ne.s32.totalorder %s2293_s14, %s2289_s13  ;;  %p74_p2 = scmp.eq.s32.totalorder %s1642_s20, 7 }
   0xc   : > { %s2911_s22 = smov (%p31_p0, %s30_s22), 0  ;;  %s2913_s23 = smov (!%p31_p0, %s33_s23), %s2309_s18 }
   0xd   : > { %s59_s25 = ssub.s32 %s2305_s17, %s2911_s22  ;;  %p2395_p3 = por %p74_p2, %p73_p1 }
   0xe   : > { %p35_p4 = scmp.ge.s32.totalorder %s2913_s23, 2  ;;  %p79_p5 = scmp.ne.s32.totalorder %s2289_s13, %s2285_s12 }
   0xf   : > { %s2894_s26 = scalar_select %p2395_p3, 1, 0 }
  0x10   : > { %p80_p6 = scmp.eq.s32.totalorder %s1643_s21, 7  ;;  %p1644_p7 = scmp.ge.s32.totalorder %s2313_s19, 1 }
  0x11   : > { %s2915_s23 = smov (%p35_p4, %s2913_s23), 0  ;;  %p115_p9 = scmp.lt.s32.totalorder %s2313_s19, 9 }
  0x12   : > { %p2404_p8 = por %p80_p6, %p79_p5  ;;  %s58_s28 = ssub.s32 %s2309_s18, %s2915_s23 }
  0x13   : > { %s60_s29 = sor.u32 %s59_s25, %s58_s28  ;;  %p2411_p10 = pnand %p1644_p7, %p115_p9 }
  0x14   : > { %s2895_s27 = scalar_select %p2404_p8, 1, 0 }
  0x15   : > { %s2896_s30 = scalar_select %p2411_p10, 1, 0 }
  0x16   : > { %p61_p11 = scmp.eq.s32.totalorder %s60_s29, 0  ;;  %p2415_p12 = scmp.eq.s32.totalorder %s1642_s20, 0 }
  0x17   : > { %p2063_p13 = pneg %p2411_p10  ;;  %s2315_s6 = smov [#allocation4]  }
  0x18   : > { %s2897_s4 = scalar_select %p2415_p12, 1, 0 }
  0x19   : > { %s2422_s5 = scalar_select %p61_p11, %s2293_s14, %s63_s24  }
  0x1a   : > { %s127_s7 = sshll.u32 %s2315_s6, 4  ;;  %p2426_p0 = pnand %p2415_p12, %p2063_p13  ;;  %s128_s7 = int_to_ptr.vmem [resolvable:$true] %s127_s7 }
  0x1b   : > { %s2153_s11 = scalar_lea.hbm %s2887_s1, 36864 }
  0x1c   : > { %p2154_p1 = scmp.ne.s32.totalorder %s2887_s1, %s2153_s11  ;;  %p2155_p2 = pneg %p2426_p0 }
  0x1d   : > { %p2160_p6 = scmp.lt.u32.totalorder %s2153_s11, %s2887_s1 }
  0x1e   : > { %p2156_p4 = pnand %p2155_p2, %p2154_p1 }
  0x20   : > { %p2157_p5 = pneg %p2156_p4 }
  0x22   : > { %p2162_p7 = pnand %p2160_p6, %p2157_p5 }
  0x24   : > { %2165 = shalt.err (!%p2162_p7)
}
  0x25   : > { %s2166_s28 = scalar_lea.vmem %s128_s7, 36864  ;;  %p2174_p8 = scmp.lt.s32.totalorder %s128_s7, %s128_s7 }
  0x26   : > { %p2167_p9 = scmp.ne.s32.totalorder %s128_s7, %s2166_s28  ;;  %p2175_p3 = scmp.lt.s32.totalorder %s2166_s28, %s2166_s28 }
  0x28   : > { %p2169_p11 = pnand %p2167_p9, %p2155_p2  ;;  %p2176_p12 = por %p2175_p3, %p2174_p8 }
  0x2a   : > { %p2170_p13 = pneg %p2169_p11 }
  0x2c   : > { %p2177_p10 = pnand %p2176_p12, %p2170_p13 }
  0x2e   : > { %2180 = shalt.err (!%p2177_p10)
}
  0x2f   : > { %s2316_s29 = smov 256   ;;  %s2317_s6 = smov 16  }
  0x30   : > { %2066 = dma.hbm_to_vmem [thread:$0]  (!%p2426_p0), %s2887_s1, 36864, %s128_s7, [#allocation5], %s2316_s29, %s2316_s29, %s2317_s6  }
  0x31   : > { %p2899_p1 = scmp.ne.s32.totalorder %s2896_s30, 0 }
  0x32   : > { %p2900_p4 = scmp.ne.s32.totalorder (!%p2899_p1), %s2897_s4, 0 }
  0x33   : > { %143 = sbr.rel (%p2899_p1) target bundleno = 522 (0x20a), region = 24 }
  0x3a   : > { %2270 = dma.done.wait (%p2900_p4), [#allocation5], 36864  }
  0x3b   : > { %2272 = vsyncadd (%p2900_p4), [#allocation5], 4294930432  ;;  %s2453_s11 = sand.u32 1, %s2289_s13   ;;  %s1651_s8 = smul.u32 96, %s2297_s15 }
  0x3c   : > { %s1648_s20 = sshll.u32 %s2453_s11, 7  ;;  %s1649_s21 = sshll.u32 %s2453_s11, 4 }
  0x3d   : > { %s168_s7 = smul.u32 432, %s2301_s16  ;;  %s2484_s4 = scalar_lea.vmem [#allocation7], %s1648_s20 }
  0x3e   : > { %s2488_s29 = scalar_lea.vmem [#allocation8], %s1649_s21 }
  0x3f   : > { %s169_s24 = sadd.s32 %s1651_s8, %s168_s7 }
  0x40   : > { %s2462_s28 = scalar_lea.vmem %s2886_s0, %s169_s24 }
  0x41   : > { %v218_v0 = vld [vmem:[%s2462_s28] sm:$0xff]  ;;  %v220_v1 = vld [vmem:[%s2462_s28 + $0x8] sm:$0xff]  ;;  %v222_v2 = vld [vmem:[%s2462_s28 + $0x18] sm:$0xff] }
  0x42   : > { %219 = vst [vmem:[#allocation2] sm:$0xff] %v218_v0  ;;  %221 = vst [vmem:[#allocation2 + $0x8] sm:$0xff] %v220_v1  ;;  %v224_v3 = vld [vmem:[%s2462_s28 + $0x20] sm:$0xff]  ;;  %v226_v4 = vld [vmem:[%s2462_s28 + $0x30] sm:$0xff] }
  0x43   : > { %223 = vst [vmem:[#allocation2 + $0x18] sm:$0xff] %v222_v2  ;;  %v228_v5 = vld [vmem:[%s2462_s28 + $0x38] sm:$0xff]  ;;  %225 = vst [vmem:[#allocation2 + $0x20] sm:$0xff] %v224_v3  ;;  %v230_v6 = vld [vmem:[%s2462_s28 + $0x48] sm:$0xff] }
  0x44   : > { %227 = vst [vmem:[#allocation2 + $0x30] sm:$0xff] %v226_v4  ;;  %229 = vst [vmem:[#allocation2 + $0x38] sm:$0xff] %v228_v5  ;;  %v232_v7 = vld [vmem:[%s2462_s28 + $0x50] sm:$0xff]  ;;  %v234_v8 = vld [vmem:[%s2462_s28 + $0x60] sm:$0xff] }
  0x45   : > { %231 = vst [vmem:[#allocation2 + $0x48] sm:$0xff] %v230_v6  ;;  %233 = vst [vmem:[#allocation2 + $0x50] sm:$0xff] %v232_v7  ;;  %v236_v9 = vld [vmem:[%s2462_s28 + $0x68] sm:$0xff]  ;;  %v238_v10 = vld [vmem:[%s2462_s28 + $0x78] sm:$0xff] }
  0x46   : > { %235 = vst [vmem:[#allocation2 + $0x60] sm:$0xff] %v234_v8  ;;  %v240_v11 = vld [vmem:[%s2462_s28 + $0x80] sm:$0xff]  ;;  %237 = vst [vmem:[#allocation2 + $0x68] sm:$0xff] %v236_v9  ;;  %v1652_v12 = vld [vmem:[%s2462_s28 + $0x10] sm:$0x3] }
  0x47   : > { %239 = vst [vmem:[#allocation2 + $0x78] sm:$0xff] %v238_v10  ;;  %241 = vst [vmem:[#allocation2 + $0x80] sm:$0xff] %v240_v11  ;;  %v1653_v13 = vld [vmem:[%s2462_s28 + $0x28] sm:$0x3]  ;;  %v1654_v14 = vld [vmem:[%s2462_s28 + $0x40] sm:$0x3] }
  0x48   : > { %252 = vst [vmem:[#allocation2 + $0x10] sm:$0x3] %v1652_v12  ;;  %254 = vst [vmem:[#allocation2 + $0x28] sm:$0x3] %v1653_v13  ;;  %v1655_v15 = vld [vmem:[%s2462_s28 + $0x58] sm:$0x3] }
  0x49   : > { %256 = vst [vmem:[#allocation2 + $0x40] sm:$0x3] %v1654_v14  ;;  %v1656_v16 = vld [vmem:[%s2462_s28 + $0x70] sm:$0x3]  ;;  %v1657_v17 = vld [vmem:[%s2462_s28 + $0x88] sm:$0x3] }
  0x4a   : > { %258 = vst [vmem:[#allocation2 + $0x58] sm:$0x3] %v1655_v15  ;;  %260 = vst [vmem:[#allocation2 + $0x70] sm:$0x3] %v1656_v16 }
  0x4b   : > { %262 = vst [vmem:[#allocation2 + $0x88] sm:$0x3] %v1657_v17 }
  0x4c   : > { %266 = vsyncadd [#allocation3], 1728 }
  0x4d   : > { %2273 = dma.done.wait [#allocation3], 1728 }
  0x4e   : > { %2274 = vsyncadd [#allocation3], 4294965568  ;;  %v2318_v18 = vmov 0.0   ;;  %v474_v19 = vld [vmem:[#allocation4 + $0x308] sm:$0xff]  ;;  %v476_v20 = vld [vmem:[#allocation4 + $0x318] sm:$0xff]  ;;  %vm301_vm0 = vcmask 1046528  }
  0x4f   : > { %746 = vmatprep.mubr.f32.mxu0 %v2318_v18  ;;  %v538_v21 = vld [vmem:[#allocation4 + $0x508] sm:$0xff]  ;;  %v1671_v22 = vpack.c.bf16 %v476_v20, %v474_v19  ;;  %v540_v23 = vld [vmem:[#allocation4 + $0x518] sm:$0xff]  ;;  %v473_v24 = vld [vmem:[#allocation4 + $0x300] sm:$0xff]  ;;  %vm330_vm1 = vcmask 1045504   ;;  %s1670_s6 = sshll.u32 %s2297_s15, 4  ;;  %s1662_s9 = sshll.u32 %s2301_s16, 6 }
  0x50   : > { %v475_v25 = vld [vmem:[#allocation4 + $0x310] sm:$0xff]  ;;  %v1735_v26 = vpack.c.bf16 %v540_v23, %v538_v21  ;;  %v537_v28 = vld [vmem:[#allocation4 + $0x500] sm:$0xff]  ;;  %v478_v30 = vld [vmem:[#allocation4 + $0x328] sm:$0xff]  ;;  %s2743_s10 = sadd.s32 %s1670_s6, %s1662_s9  ;;  %s1491_s8 = sshll.u32 %s2484_s4, 4  ;;  %s2762_s8 = int_to_ptr.vmem [resolvable:$true] %s1491_s8 }
  0x51   : > { %v1673_v27 = vpack.c.bf16 %v475_v25, %v473_v24  ;;  %v539_v29 = vld [vmem:[#allocation4 + $0x510] sm:$0xff]  ;;  %1672 = vmatprep.subr.bf16.mxu1 %v1671_v22  ;;  %v480_v32 = vld [vmem:[#allocation4 + $0x338] sm:$0xff]  ;;  %v542_v33 = vld [vmem:[#allocation4 + $0x528] sm:$0xff]  ;;  %s1663_s20 = sshll.u32 %s2743_s10, 7  ;;  %s1470_s30 = scalar_lea.sflag [#allocation6], %s2453_s11 }
  0x52   : > { %v1737_v31 = vpack.c.bf16 %v539_v29, %v537_v28  ;;  %v544_v34 = vld [vmem:[#allocation4 + $0x538] sm:$0xff]  ;;  %1736 = vmatprep.subr.bf16.mxu0 %v1735_v26  ;;  %v1675_v35 = vpack.c.bf16 %v480_v32, %v478_v30  ;;  %v477_v37 = vld [vmem:[#allocation4 + $0x320] sm:$0xff]  ;;  %v479_v38 = vld [vmem:[#allocation4 + $0x330] sm:$0xff]  ;;  %s2770_s24 = scalar_lea.hbm %s2888_s2, %s1663_s20  ;;  %s2181_s25 = scalar_lea.vmem %s2762_s8, 2048 }
  0x53   : > { %1674 = vmatpush1.bf16.msra.mxu1 %v1673_v27  ;;  %v1739_v36 = vpack.c.bf16 %v544_v34, %v542_v33  ;;  %v541_v39 = vld [vmem:[#allocation4 + $0x520] sm:$0xff]  ;;  %v1677_v40 = vpack.c.bf16 %v479_v38, %v477_v37  ;;  %v543_v41 = vld [vmem:[#allocation4 + $0x530] sm:$0xff]  ;;  %v482_v42 = vld [vmem:[#allocation4 + $0x348] sm:$0xff]  ;;  %p2182_p3 = scmp.ne.s32.totalorder %s2762_s8, %s2181_s25  ;;  %p2901_p8 = scmp.ne.s32.totalorder %s2894_s26, 0 }
  0x54   : > { %1738 = vmatpush1.bf16.msra.mxu0 %v1737_v31  ;;  %v484_v43 = vld [vmem:[#allocation4 + $0x358] sm:$0xff]  ;;  %1676 = vmatprep.subr.bf16.mxu1 %v1675_v35  ;;  %v1741_v44 = vpack.c.bf16 %v543_v41, %v541_v39  ;;  %v546_v46 = vld [vmem:[#allocation4 + $0x548] sm:$0xff]  ;;  %v481_v48 = vld [vmem:[#allocation4 + $0x340] sm:$0xff]  ;;  %s2319_s28 = smov [#allocation7]  }
  0x55   : > { %1740 = vmatprep.subr.bf16.mxu0 %v1739_v36  ;;  %v1679_v45 = vpack.c.bf16 %v484_v43, %v482_v42  ;;  %v548_v47 = vld [vmem:[#allocation4 + $0x558] sm:$0xff]  ;;  %v483_v50 = vld [vmem:[#allocation4 + $0x350] sm:$0xff]  ;;  %v545_v51 = vld [vmem:[#allocation4 + $0x540] sm:$0xff]  ;;  %p2183_p10 = pnand %p2182_p3, %p2901_p8  ;;  %s2185_s6 = sshll.u32 %s2319_s28, 4  ;;  %s2186_s6 = int_to_ptr.vmem [resolvable:$false] %s2185_s6 }
  0x56   : > { %v1743_v49 = vpack.c.bf16 %v548_v47, %v546_v46  ;;  %v547_v52 = vld [vmem:[#allocation4 + $0x550] sm:$0xff]  ;;  %v1681_v53 = vpack.c.bf16 %v483_v50, %v481_v48  ;;  %v486_v54 = vld [vmem:[#allocation4 + $0x368] sm:$0xff]  ;;  %v488_v55 = vld [vmem:[#allocation4 + $0x378] sm:$0xff]  ;;  %s2187_s9 = scalar_lea.vmem %s2186_s6, 4096  ;;  %p2188_p0 = scmp.lt.s32.totalorder %s2762_s8, %s2186_s6 }
  0x57   : > { %1678 = vmatpush1.bf16.msra.mxu1 %v1677_v40  ;;  %v550_v56 = vld [vmem:[#allocation4 + $0x568] sm:$0xff]  ;;  %v1745_v57 = vpack.c.bf16 %v547_v52, %v545_v51  ;;  %v1683_v58 = vpack.c.bf16 %v488_v55, %v486_v54  ;;  %v552_v59 = vld [vmem:[#allocation4 + $0x578] sm:$0xff]  ;;  %v485_v60 = vld [vmem:[#allocation4 + $0x360] sm:$0xff]  ;;  %p2184_p12 = pneg %p2183_p10  ;;  %p2189_p2 = scmp.lt.s32.totalorder %s2187_s9, %s2181_s25 }
  0x58   : > { %1742 = vmatpush1.bf16.msra.mxu0 %v1741_v44  ;;  %1680 = vmatprep.subr.bf16.mxu1 %v1679_v45  ;;  %v487_v61 = vld [vmem:[#allocation4 + $0x370] sm:$0xff]  ;;  %v1747_v62 = vpack.c.bf16 %v552_v59, %v550_v56  ;;  %v549_v63 = vld [vmem:[#allocation4 + $0x560] sm:$0xff]  ;;  %v490_v1 = vld [vmem:[#allocation4 + $0x388] sm:$0xff] }
  0x59   : > { %1744 = vmatprep.subr.bf16.mxu0 %v1743_v49  ;;  %v551_v0 = vld [vmem:[#allocation4 + $0x570] sm:$0xff]  ;;  %v492_v2 = vld [vmem:[#allocation4 + $0x398] sm:$0xff]  ;;  %v554_v3 = vld [vmem:[#allocation4 + $0x588] sm:$0xff]  ;;  %v1685_v5 = vpack.c.bf16 %v487_v61, %v485_v60  ;;  %p2190_p5 = por %p2189_p2, %p2188_p0 }
  0x5a   : > { %v556_v4 = vld [vmem:[#allocation4 + $0x598] sm:$0xff]  ;;  %v1749_v6 = vpack.c.bf16 %v551_v0, %v549_v63  ;;  %v1687_v7 = vpack.c.bf16 %v492_v2, %v490_v1  ;;  %v489_v8 = vld [vmem:[#allocation4 + $0x380] sm:$0xff]  ;;  %v491_v9 = vld [vmem:[#allocation4 + $0x390] sm:$0xff] }
  0x5b   : > { %1682 = vmatpush1.bf16.msra.mxu1 %v1681_v53  ;;  %v553_v10 = vld [vmem:[#allocation4 + $0x580] sm:$0xff]  ;;  %v1751_v11 = vpack.c.bf16 %v556_v4, %v554_v3  ;;  %v555_v12 = vld [vmem:[#allocation4 + $0x590] sm:$0xff]  ;;  %v494_v13 = vld [vmem:[#allocation4 + $0x3a8] sm:$0xff]  ;;  %v1689_v17 = vpack.c.bf16 %v491_v9, %v489_v8  ;;  %p2191_p6 = pnand %p2190_p5, %p2184_p12 }
  0x5c   : > { %1746 = vmatpush1.bf16.msra.mxu0 %v1745_v57  ;;  %1684 = vmatprep.subr.bf16.mxu1 %v1683_v58  ;;  %v496_v14 = vld [vmem:[#allocation4 + $0x3b8] sm:$0xff]  ;;  %v558_v15 = vld [vmem:[#allocation4 + $0x5a8] sm:$0xff]  ;;  %v1753_v19 = vpack.c.bf16 %v555_v12, %v553_v10  ;;  %v493_v21 = vld [vmem:[#allocation4 + $0x3a0] sm:$0xff] }
  0x5d   : > { %1748 = vmatprep.subr.bf16.mxu0 %v1747_v62  ;;  %v560_v16 = vld [vmem:[#allocation4 + $0x5b8] sm:$0xff]  ;;  %v1691_v20 = vpack.c.bf16 %v496_v14, %v494_v13  ;;  %v495_v22 = vld [vmem:[#allocation4 + $0x3b0] sm:$0xff]  ;;  %v557_v23 = vld [vmem:[#allocation4 + $0x5a0] sm:$0xff] }
  0x5e   : > { %v1755_v24 = vpack.c.bf16 %v560_v16, %v558_v15  ;;  %v559_v25 = vld [vmem:[#allocation4 + $0x5b0] sm:$0xff]  ;;  %v498_v26 = vld [vmem:[#allocation4 + $0x3c8] sm:$0xff]  ;;  %v500_v27 = vld [vmem:[#allocation4 + $0x3d8] sm:$0xff]  ;;  %v1693_v30 = vpack.c.bf16 %v495_v22, %v493_v21 }
  0x5f   : > { %1686 = vmatpush1.bf16.msra.mxu1 %v1685_v5  ;;  %v562_v28 = vld [vmem:[#allocation4 + $0x5c8] sm:$0xff]  ;;  %v564_v29 = vld [vmem:[#allocation4 + $0x5d8] sm:$0xff]  ;;  %v497_v31 = vld [vmem:[#allocation4 + $0x3c0] sm:$0xff]  ;;  %v1757_v32 = vpack.c.bf16 %v559_v25, %v557_v23  ;;  %v1695_v33 = vpack.c.bf16 %v500_v27, %v498_v26 }
  0x60   : > { %1750 = vmatpush1.bf16.msra.mxu0 %v1749_v6  ;;  %1688 = vmatprep.subr.bf16.mxu1 %v1687_v7  ;;  %v499_v34 = vld [vmem:[#allocation4 + $0x3d0] sm:$0xff]  ;;  %v561_v35 = vld [vmem:[#allocation4 + $0x5c0] sm:$0xff]  ;;  %v1759_v37 = vpack.c.bf16 %v564_v29, %v562_v28  ;;  %v502_v38 = vld [vmem:[#allocation4 + $0x3e8] sm:$0xff] }
  0x61   : > { %1752 = vmatprep.subr.bf16.mxu0 %v1751_v11  ;;  %v563_v36 = vld [vmem:[#allocation4 + $0x5d0] sm:$0xff]  ;;  %v504_v39 = vld [vmem:[#allocation4 + $0x3f8] sm:$0xff]  ;;  %v2491_v40 = vld [vmem:[#allocation2 + $0x18] sm:$0xff]  ;;  %v1697_v45 = vpack.c.bf16 %v499_v34, %v497_v31 }
  0x62   : > { %v566_v41 = vld [vmem:[#allocation4 + $0x5e8] sm:$0xff]  ;;  %v568_v42 = vld [vmem:[#allocation4 + $0x5f8] sm:$0xff]  ;;  %v2493_v43 = vld [vmem:[#allocation2 + $0x20] sm:$0xff]  ;;  %v307_v44 = vrot.slane %v2491_v40, 1  ;;  %v1761_v47 = vpack.c.bf16 %v563_v36, %v561_v35  ;;  %v1699_v48 = vpack.c.bf16 %v504_v39, %v502_v38  ;;  %v336_v62 = vrot.slane %v2491_v40, 2 }
  0x63   : > { %1690 = vmatpush1.bf16.msra.mxu1 %v1689_v17  ;;  %v308_v46 = vrot.slane %v2493_v43, 1  ;;  %v501_v49 = vld [vmem:[#allocation4 + $0x3e0] sm:$0xff]  ;;  %v503_v50 = vld [vmem:[#allocation4 + $0x3f0] sm:$0xff]  ;;  %v1763_v52 = vpack.c.bf16 %v568_v42, %v566_v41  ;;  %v506_v54 = vld [vmem:[#allocation4 + $0x408] sm:$0xff]  ;;  %v337_v63 = vrot.slane %v2493_v43, 2 }
  0x64   : > { %1754 = vmatpush1.bf16.msra.mxu0 %v1753_v19  ;;  %1692 = vmatprep.subr.bf16.mxu1 %v1691_v20  ;;  %v565_v51 = vld [vmem:[#allocation4 + $0x5e0] sm:$0xff]  ;;  %v567_v53 = vld [vmem:[#allocation4 + $0x5f0] sm:$0xff]  ;;  %v508_v55 = vld [vmem:[#allocation4 + $0x418] sm:$0xff]  ;;  %v1701_v59 = vpack.c.bf16 %v503_v50, %v501_v49 }
  0x65   : > { %1756 = vmatprep.subr.bf16.mxu0 %v1755_v24  ;;  %v2500_v56 = vsel %vm301_vm0, %v307_v44, %v308_v46  ;;  %v424_v57 = vld [vmem:[#allocation4 + $0x208] sm:$0xff]  ;;  %v426_v58 = vld [vmem:[#allocation4 + $0x218] sm:$0xff]  ;;  %v1765_v60 = vpack.c.bf16 %v567_v53, %v565_v51  ;;  %v1703_v61 = vpack.c.bf16 %v508_v55, %v506_v54  ;;  %v505_v0 = vld [vmem:[#allocation4 + $0x400] sm:$0xff]  ;;  %v2508_v12 = vsel %vm330_vm1, %v336_v62, %v337_v63 }
  0x66   : > { %633 = vmatprep.mubr.f32.mxu1 %v2500_v56  ;;  %v507_v1 = vld [vmem:[#allocation4 + $0x410] sm:$0xff]  ;;  %v423_v2 = vld [vmem:[#allocation4 + $0x200] sm:$0xff]  ;;  %v1831_v3 = vpack.c.bf16 %v426_v58, %v424_v57  ;;  %v510_v5 = vld [vmem:[#allocation4 + $0x428] sm:$0xff] }
  0x67   : > { %1694 = vmatpush1.bf16.msra.mxu1 %v1693_v30  ;;  %v425_v4 = vld [vmem:[#allocation4 + $0x210] sm:$0xff]  ;;  %v2505_v6 = vld [vmem:[#allocation2 + $0x28] sm:$0x3]  ;;  %v428_v8 = vld [vmem:[#allocation4 + $0x228] sm:$0xff]  ;;  %v1705_v10 = vpack.c.bf16 %v507_v1, %v505_v0 }
  0x68   : > { %1758 = vmatpush1.bf16.msra.mxu0 %v1757_v32  ;;  %1696 = vmatprep.subr.bf16.mxu1 %v1695_v33  ;;  %v512_v7 = vld [vmem:[#allocation4 + $0x438] sm:$0xff]  ;;  %v509_v11 = vld [vmem:[#allocation4 + $0x420] sm:$0xff]  ;;  %v1833_v13 = vpack.c.bf16 %v425_v4, %v423_v2  ;;  %v339_v14 = vrot.slane %v2505_v6, 2  ;;  %v511_v15 = vld [vmem:[#allocation4 + $0x430] sm:$0xff] }
  0x69   : > { %1760 = vmatprep.subr.bf16.mxu0 %v1759_v37  ;;  %v430_v9 = vld [vmem:[#allocation4 + $0x238] sm:$0xff]  ;;  %v427_v16 = vld [vmem:[#allocation4 + $0x220] sm:$0xff]  ;;  %v429_v17 = vld [vmem:[#allocation4 + $0x230] sm:$0xff]  ;;  %v1707_v19 = vpack.c.bf16 %v512_v7, %v510_v5  ;;  %v1709_v27 = vpack.c.bf16 %v511_v15, %v509_v11 }
  0x6a   : > { %v1835_v20 = vpack.c.bf16 %v430_v9, %v428_v8  ;;  %v514_v21 = vld [vmem:[#allocation4 + $0x448] sm:$0xff]  ;;  %v2511_v22 = vld [vmem:[#allocation2 + $0x30] sm:$0xff]  ;;  %v516_v24 = vld [vmem:[#allocation4 + $0x458] sm:$0xff]  ;;  %v2518_v28 = vsel %vm330_vm1, %v337_v63, %v339_v14  ;;  %v1837_v29 = vpack.c.bf16 %v429_v17, %v427_v16 }
  0x6b   : > { %1698 = vmatpush1.bf16.msra.mxu1 %v1697_v45  ;;  %v2513_v23 = vld [vmem:[#allocation2 + $0x38] sm:$0xff]  ;;  %v434_v26 = vld [vmem:[#allocation4 + $0x258] sm:$0xff]  ;;  %v341_v30 = vrot.slane %v2511_v22, 2  ;;  %v513_v32 = vld [vmem:[#allocation4 + $0x440] sm:$0xff]  ;;  %v1711_v35 = vpack.c.bf16 %v516_v24, %v514_v21 }
  0x6c   : > { %1762 = vmatpush1.bf16.msra.mxu0 %v1761_v47  ;;  %1700 = vmatprep.subr.bf16.mxu1 %v1699_v48  ;;  %v432_v25 = vld [vmem:[#allocation4 + $0x248] sm:$0xff]  ;;  %v342_v31 = vrot.slane %v2513_v23, 2  ;;  %v515_v33 = vld [vmem:[#allocation4 + $0x450] sm:$0xff]  ;;  %v431_v34 = vld [vmem:[#allocation4 + $0x240] sm:$0xff] }
  0x6d   : > { %1764 = vmatprep.subr.bf16.mxu0 %v1763_v52  ;;  %v1839_v36 = vpack.c.bf16 %v434_v26, %v432_v25  ;;  %v433_v37 = vld [vmem:[#allocation4 + $0x250] sm:$0xff]  ;;  %v518_v38 = vld [vmem:[#allocation4 + $0x468] sm:$0xff]  ;;  %v520_v41 = vld [vmem:[#allocation4 + $0x478] sm:$0xff]  ;;  %v1713_v45 = vpack.c.bf16 %v515_v33, %v513_v32 }
  0x6e   : > { %v2522_v39 = vld [vmem:[#allocation2 + $0x40] sm:$0x3]  ;;  %v436_v42 = vld [vmem:[#allocation4 + $0x268] sm:$0xff]  ;;  %v438_v44 = vld [vmem:[#allocation4 + $0x278] sm:$0xff]  ;;  %v2527_v48 = vsel %vm330_vm1, %v341_v30, %v342_v31  ;;  %v1841_v49 = vpack.c.bf16 %v433_v37, %v431_v34  ;;  %v1715_v54 = vpack.c.bf16 %v520_v41, %v518_v38 }
  0x6f   : > { %1702 = vmatpush1.bf16.msra.mxu1 %v1701_v59  ;;  %v517_v47 = vld [vmem:[#allocation4 + $0x460] sm:$0xff]  ;;  %v344_v50 = vrot.slane %v2522_v39, 2  ;;  %v519_v51 = vld [vmem:[#allocation4 + $0x470] sm:$0xff]  ;;  %v1843_v55 = vpack.c.bf16 %v438_v44, %v436_v42  ;;  %v522_v57 = vld [vmem:[#allocation4 + $0x488] sm:$0xff] }
  0x70   : > { %1766 = vmatpush1.bf16.msra.mxu0 %v1765_v60  ;;  %1704 = vmatprep.subr.bf16.mxu1 %v1703_v61  ;;  %v435_v52 = vld [vmem:[#allocation4 + $0x260] sm:$0xff]  ;;  %v437_v53 = vld [vmem:[#allocation4 + $0x270] sm:$0xff]  ;;  %v2530_v58 = vld [vmem:[#allocation2 + $0x48] sm:$0xff]  ;;  %v1717_v63 = vpack.c.bf16 %v519_v51, %v517_v47 }
  0x71   : > { %1832 = vmatprep.subr.bf16.mxu0 %v1831_v3  ;;  %v2532_v59 = vld [vmem:[#allocation2 + $0x50] sm:$0xff]  ;;  %v524_v60 = vld [vmem:[#allocation4 + $0x498] sm:$0xff]  ;;  %v440_v61 = vld [vmem:[#allocation4 + $0x288] sm:$0xff]  ;;  %v2537_v0 = vsel %vm330_vm1, %v342_v31, %v344_v50  ;;  %v1845_v1 = vpack.c.bf16 %v437_v53, %v435_v52  ;;  %v346_v2 = vrot.slane %v2530_v58, 2 }
  0x72   : > { %v442_v62 = vld [vmem:[#allocation4 + $0x298] sm:$0xff]  ;;  %v347_v3 = vrot.slane %v2532_v59, 2  ;;  %v521_v4 = vld [vmem:[#allocation4 + $0x480] sm:$0xff]  ;;  %v523_v5 = vld [vmem:[#allocation4 + $0x490] sm:$0xff]  ;;  %v1719_v8 = vpack.c.bf16 %v524_v60, %v522_v57 }
  0x73   : > { %747 = vmatmul.mubr.f32.vlgmr.msra.gmra.mrb[0].mxu0 %v2508_v12  ;;  %1706 = vmatpush1.bf16.msra.mxu1 %v1705_v10  ;;  %v439_v7 = vld [vmem:[#allocation4 + $0x280] sm:$0xff]  ;;  %v1847_v9 = vpack.c.bf16 %v442_v62, %v440_v61  ;;  %v441_v10 = vld [vmem:[#allocation4 + $0x290] sm:$0xff]  ;;  %v526_v11 = vld [vmem:[#allocation4 + $0x4a8] sm:$0xff]  ;;  %v1721_v17 = vpack.c.bf16 %v523_v5, %v521_v4 }
  0x74   : > { %1834 = vmatpush1.bf16.msra.mxu0 %v1833_v13  ;;  %752 = vmatprep.mubr.f32.mxu0 %v2318_v18  ;;  %v2541_v13 = vld [vmem:[#allocation2 + $0x58] sm:$0x3]  ;;  %v528_v14 = vld [vmem:[#allocation4 + $0x4b8] sm:$0xff]  ;;  %v1849_v21 = vpack.c.bf16 %v441_v10, %v439_v7  ;;  %v527_v25 = vld [vmem:[#allocation4 + $0x4b0] sm:$0xff] }
  0x75   : > { %1708 = vmatprep.subr.bf16.mxu1 %v1707_v19  ;;  %1836 = vmatprep.subr.bf16.mxu0 %v1835_v20  ;;  %v444_v15 = vld [vmem:[#allocation4 + $0x2a8] sm:$0xff]  ;;  %v446_v16 = vld [vmem:[#allocation4 + $0x2b8] sm:$0xff]  ;;  %v525_v19 = vld [vmem:[#allocation4 + $0x4a0] sm:$0xff]  ;;  %v2546_v20 = vsel %vm330_vm1, %v346_v2, %v347_v3  ;;  %v349_v24 = vrot.slane %v2541_v13, 2 }
  0x76   : > { %v443_v26 = vld [vmem:[#allocation4 + $0x2a0] sm:$0xff]  ;;  %v1851_v30 = vpack.c.bf16 %v446_v16, %v444_v15  ;;  %v530_v31 = vld [vmem:[#allocation4 + $0x4c8] sm:$0xff]  ;;  %v2549_v32 = vld [vmem:[#allocation2 + $0x60] sm:$0xff]  ;;  %v1725_v37 = vpack.c.bf16 %v527_v25, %v525_v19 }
  0x77   : > { %753 = vmatmul.mubr.f32.gmra.mrb[2].mxu0 %v2518_v28  ;;  %1710 = vmatpush1.bf16.msra.mxu1 %v1709_v27  ;;  %v445_v27 = vld [vmem:[#allocation4 + $0x2b0] sm:$0xff]  ;;  %v2551_v33 = vld [vmem:[#allocation2 + $0x68] sm:$0xff]  ;;  %v2556_v38 = vsel %vm330_vm1, %v347_v3, %v349_v24  ;;  %v465_v42 = vrot.slane %v2549_v32, 2  ;;  %v447_v52 = vld [vmem:[#allocation4 + $0x2c0] sm:$0xff] }
  0x78   : > { %1838 = vmatpush1.bf16.msra.mxu0 %v1837_v29  ;;  %758 = vmatprep.mubr.f32.mxu0 %v2318_v18  ;;  %v1723_v29 = vpack.c.bf16 %v528_v14, %v526_v11  ;;  %v532_v34 = vld [vmem:[#allocation4 + $0x4d8] sm:$0xff]  ;;  %v1853_v41 = vpack.c.bf16 %v445_v27, %v443_v26  ;;  %v466_v44 = vrot.slane %v2551_v33, 2  ;;  %v531_v47 = vld [vmem:[#allocation4 + $0x4d0] sm:$0xff]  ;;  %v452_v57 = vld [vmem:[#allocation4 + $0x2e8] sm:$0xff] }
  0x79   : > { %1712 = vmatprep.subr.bf16.mxu1 %v1711_v35  ;;  %1840 = vmatprep.subr.bf16.mxu0 %v1839_v36  ;;  %v448_v35 = vld [vmem:[#allocation4 + $0x2c8] sm:$0xff]  ;;  %v450_v36 = vld [vmem:[#allocation4 + $0x2d8] sm:$0xff]  ;;  %v1727_v50 = vpack.c.bf16 %v532_v34, %v530_v31  ;;  %v449_v53 = vld [vmem:[#allocation4 + $0x2d0] sm:$0xff] }
  0x7a   : > { %v1855_v51 = vpack.c.bf16 %v450_v36, %v448_v35  ;;  %v454_v60 = vld [vmem:[#allocation4 + $0x2f8] sm:$0xff]  ;;  %v2566_v2 = vsel %vm330_vm1, %v465_v42, %v466_v44  ;;  %v1857_v3 = vpack.c.bf16 %v449_v53, %v447_v52  ;;  %v451_v4 = vld [vmem:[#allocation4 + $0x2e0] sm:$0xff]  ;;  %v453_v5 = vld [vmem:[#allocation4 + $0x2f0] sm:$0xff]  ;;  %v310_v35 = vrot.slane %v2505_v6, 1 }
  0x7b   : > { %759 = vmatmul.mubr.f32.gmra.mrb[4].mxu0 %v2527_v48  ;;  %1714 = vmatpush1.bf16.msra.mxu1 %v1713_v45  ;;  %v529_v45 = vld [vmem:[#allocation4 + $0x4c0] sm:$0xff]  ;;  %v360_v7 = vld [vmem:[#allocation4 + $0x8] sm:$0xff]  ;;  %v362_v10 = vld [vmem:[#allocation4 + $0x18] sm:$0xff]  ;;  %v312_v6 = vrot.slane %v2511_v22, 1  ;;  %v313_v53 = vrot.slane %v2513_v23, 1 }
  0x7c   : > { %1842 = vmatpush1.bf16.msra.mxu0 %v1841_v49  ;;  %764 = vmatprep.mubr.f32.mxu0 %v2318_v18  ;;  %v2560_v49 = vld [vmem:[#allocation2 + $0x70] sm:$0x3]  ;;  %v1729_v61 = vpack.c.bf16 %v531_v47, %v529_v45  ;;  %v2568_v11 = vld [vmem:[#allocation2] sm:$0xff]  ;;  %v2570_v14 = vld [vmem:[#allocation2 + $0x8] sm:$0xff]  ;;  %v1767_v24 = vpack.c.bf16 %v362_v10, %v360_v7 }
  0x7d   : > { %1716 = vmatprep.subr.bf16.mxu1 %v1715_v54  ;;  %1844 = vmatprep.subr.bf16.mxu0 %v1843_v55  ;;  %v534_v54 = vld [vmem:[#allocation4 + $0x4e8] sm:$0xff]  ;;  %v536_v55 = vld [vmem:[#allocation4 + $0x4f8] sm:$0xff]  ;;  %v468_v62 = vrot.slane %v2560_v49, 2  ;;  %v359_v25 = vld [vmem:[#allocation4] sm:$0xff]  ;;  %v331_v27 = vrot.slane %v2568_v11, 2 }
  0x7e   : > { %v1040_v15 = vld [vmem:[#allocation4 + $0x608] sm:$0xff]  ;;  %v1042_v16 = vld [vmem:[#allocation4 + $0x618] sm:$0xff]  ;;  %v361_v26 = vld [vmem:[#allocation4 + $0x10] sm:$0xff] }
  0x7f   : > { %765 = vmatmul.mubr.f32.gmra.mrb[6].mxu0 %v2537_v0  ;;  %1718 = vmatpush1.bf16.msra.mxu1 %v1717_v63  ;;  %v533_v63 = vld [vmem:[#allocation4 + $0x4e0] sm:$0xff]  ;;  %v1041_v34 = vld [vmem:[#allocation4 + $0x610] sm:$0xff]  ;;  %v364_v36 = vld [vmem:[#allocation4 + $0x28] sm:$0xff] }
  0x80   : > { %1846 = vmatpush1.bf16.msra.mxu0 %v1845_v1  ;;  %770 = vmatprep.mubr.f32.mxu0 %v2318_v18  ;;  %v535_v1 = vld [vmem:[#allocation4 + $0x4f0] sm:$0xff]  ;;  %v1039_v31 = vld [vmem:[#allocation4 + $0x600] sm:$0xff]  ;;  %v1046_v42 = vld [vmem:[#allocation4 + $0x638] sm:$0xff] }
  0x81   : > { %1720 = vmatprep.subr.bf16.mxu1 %v1719_v8  ;;  %1848 = vmatprep.subr.bf16.mxu0 %v1847_v9  ;;  %v1731_v8 = vpack.c.bf16 %v536_v55, %v534_v54  ;;  %v1859_v9 = vpack.c.bf16 %v454_v60, %v452_v57  ;;  %v1733_v19 = vpack.c.bf16 %v535_v1, %v533_v63  ;;  %v1043_v52 = vld [vmem:[#allocation4 + $0x620] sm:$0xff]  ;;  %v1045_v60 = vld [vmem:[#allocation4 + $0x630] sm:$0xff]  ;;  %v1048_v63 = vld [vmem:[#allocation4 + $0x648] sm:$0xff] }
  0x82   : > { %v1865_v47 = vpack.c.bf16 %v1041_v34, %v1039_v31  ;;  %v2590_v54 = vsel %vm301_vm0, %v308_v46, %v310_v35  ;;  %v1050_v1 = vld [vmem:[#allocation4 + $0x658] sm:$0xff]  ;;  %v2596_v46 = vsel %vm301_vm0, %v312_v6, %v313_v53  ;;  %v1047_v10 = vld [vmem:[#allocation4 + $0x640] sm:$0xff]  ;;  %v373_v34 = vld [vmem:[#allocation4 + $0x70] sm:$0xff]  ;;  %v320_v6 = vrot.slane %v2541_v13, 1 }
  0x83   : > { %771 = vmatmul.mubr.f32.gmra.mrb[8].mxu0 %v2546_v20  ;;  %1722 = vmatpush1.bf16.msra.mxu1 %v1721_v17  ;;  %v2574_v17 = vsel %vm330_vm1, %v466_v44, %v468_v62  ;;  %v1769_v44 = vpack.c.bf16 %v361_v26, %v359_v25  ;;  %v370_v62 = vld [vmem:[#allocation4 + $0x58] sm:$0xff]  ;;  %v317_v26 = vrot.slane %v2530_v58, 1  ;;  %v1051_v35 = vld [vmem:[#allocation4 + $0x660] sm:$0xff] }
  0x84   : > { %1850 = vmatpush1.bf16.msra.mxu0 %v1849_v21  ;;  %776 = vmatprep.mubr.f32.mxu0 %v2318_v18  ;;  %v1861_v21 = vpack.c.bf16 %v453_v5, %v451_v4  ;;  %v315_v4 = vrot.slane %v2522_v39, 1  ;;  %v1869_v5 = vpack.c.bf16 %v1045_v60, %v1043_v52  ;;  %v1052_v39 = vld [vmem:[#allocation4 + $0x668] sm:$0xff]  ;;  %v375_v60 = vld [vmem:[#allocation4 + $0x80] sm:$0xff]  ;;  %v1062_v13 = vld [vmem:[#allocation4 + $0x6b8] sm:$0xff] }
  0x85   : > { %1724 = vmatprep.subr.bf16.mxu1 %v1723_v29  ;;  %1852 = vmatprep.subr.bf16.mxu0 %v1851_v30  ;;  %v332_v29 = vrot.slane %v2570_v14, 2  ;;  %v1863_v30 = vpack.c.bf16 %v1042_v16, %v1040_v15  ;;  %v1049_v15 = vld [vmem:[#allocation4 + $0x650] sm:$0xff]  ;;  %v372_v16 = vld [vmem:[#allocation4 + $0x68] sm:$0xff] }
  0x86   : > { %v2602_v25 = vsel %vm301_vm0, %v313_v53, %v315_v4  ;;  %v1060_v4 = vld [vmem:[#allocation4 + $0x6a8] sm:$0xff] }
  0x87   : > { %777 = vmatmul.mubr.f32.gmra.mrb[10].mxu0 %v2556_v38  ;;  %1726 = vmatpush1.bf16.msra.mxu1 %v1725_v37  ;;  %v366_v37 = vld [vmem:[#allocation4 + $0x38] sm:$0xff]  ;;  %v333_v45 = vsel %vm330_vm1, %v331_v27, %v332_v29  ;;  %v2605_v27 = vld [vmem:[#allocation2 + $0x10] sm:$0x3] }
  0x88   : > { %1854 = vmatpush1.bf16.msra.mxu0 %v1853_v41  ;;  %782 = vmatprep.mubr.f32.mxu0 %v2318_v18  ;;  %v1044_v41 = vld [vmem:[#allocation4 + $0x628] sm:$0xff]  ;;  %v1771_v55 = vpack.c.bf16 %v366_v37, %v364_v36  ;;  %v318_v36 = vrot.slane %v2532_v59, 1  ;;  %v334_v37 = vrot.slane %v2605_v27, 2 }
  0x89   : > { %1728 = vmatprep.subr.bf16.mxu1 %v1727_v50  ;;  %1856 = vmatprep.subr.bf16.mxu0 %v1855_v51  ;;  %v363_v50 = vld [vmem:[#allocation4 + $0x20] sm:$0xff]  ;;  %v365_v51 = vld [vmem:[#allocation4 + $0x30] sm:$0xff]  ;;  %v1867_v57 = vpack.c.bf16 %v1046_v42, %v1044_v41 }
  0x8a   : > { %v1053_v42 = vld [vmem:[#allocation4 + $0x670] sm:$0xff] }
  0x8b   : > { %783 = vmatmul.mubr.f32.gmra.mrb[12].mxu0 %v2566_v2  ;;  %1730 = vmatpush1.bf16.msra.mxu1 %v1729_v61  ;;  %v368_v61 = vld [vmem:[#allocation4 + $0x48] sm:$0xff]  ;;  %v1877_v53 = vpack.c.bf16 %v1053_v42, %v1051_v35  ;;  %v1063_v42 = vld [vmem:[#allocation4 + $0x6c0] sm:$0xff] }
  0x8c   : > { %1858 = vmatpush1.bf16.msra.mxu0 %v1857_v3  ;;  %788 = vmatprep.mubr.f32.mxu0 %v2318_v18  ;;  %v1773_v3 = vpack.c.bf16 %v365_v51, %v363_v50  ;;  %v1775_v7 = vpack.c.bf16 %v370_v62, %v368_v61  ;;  %v1058_v50 = vld [vmem:[#allocation4 + $0x698] sm:$0xff]  ;;  %v335_v51 = vsel %vm330_vm1, %v332_v29, %v334_v37  ;;  %v377_v61 = vld [vmem:[#allocation4 + $0x90] sm:$0xff]  ;;  %v1055_v62 = vld [vmem:[#allocation4 + $0x680] sm:$0xff] }
  0x8d   : > { %1732 = vmatprep.subr.bf16.mxu1 %v1731_v8  ;;  %1860 = vmatprep.subr.bf16.mxu0 %v1859_v9  ;;  %v367_v8 = vld [vmem:[#allocation4 + $0x40] sm:$0xff]  ;;  %v369_v9 = vld [vmem:[#allocation4 + $0x50] sm:$0xff]  ;;  %v380_v29 = vld [vmem:[#allocation4 + $0xa8] sm:$0xff] }
  0x8f   : > { %789 = vmatmul.mubr.f32.gmra.mrb[14].mxu0 %v2574_v17  ;;  %1734 = vmatpush1.bf16.msra.mxu1 %v1733_v19  ;;  %v374_v19 = vld [vmem:[#allocation4 + $0x78] sm:$0xff] }
  0x90   : > { %1862 = vmatpush1.bf16.msra.mxu0 %v1861_v21  ;;  %1768 = vmatprep.subr.bf16.mxu1 %v1767_v24  ;;  %v1054_v21 = vld [vmem:[#allocation4 + $0x678] sm:$0xff]  ;;  %v1777_v24 = vpack.c.bf16 %v369_v9, %v367_v8  ;;  %v1779_v31 = vpack.c.bf16 %v374_v19, %v372_v16  ;;  %v458_v16 = vrot.slane %v2549_v32, 1  ;;  %v459_v19 = vrot.slane %v2551_v33, 1 }
  0x91   : > { %972 = vmatprep.mubr.f32.mxu0 %v2318_v18  ;;  %1864 = vmatprep.subr.bf16.mxu0 %v1863_v30  ;;  %v1873_v30 = vpack.c.bf16 %v1049_v15, %v1047_v10  ;;  %v1875_v41 = vpack.c.bf16 %v1054_v21, %v1052_v39  ;;  %v379_v10 = vld [vmem:[#allocation4 + $0xa0] sm:$0xff]  ;;  %v1883_v39 = vpack.c.bf16 %v1062_v13, %v1060_v4  ;;  %v1061_v21 = vld [vmem:[#allocation4 + $0x6b0] sm:$0xff]  ;;  %v394_v4 = vld [vmem:[#allocation4 + $0x118] sm:$0xff] }
  0x92   : > { %634 = vmatmul.mubr.f32.vlgmr.msra.gmra.mrb[0].mxu1 %v2491_v40  ;;  %v1871_v40 = vpack.c.bf16 %v1050_v1, %v1048_v63  ;;  %v1057_v1 = vld [vmem:[#allocation4 + $0x690] sm:$0xff]  ;;  %v1059_v15 = vld [vmem:[#allocation4 + $0x6a0] sm:$0xff]  ;;  %v1072_v13 = vld [vmem:[#allocation4 + $0x708] sm:$0xff] }
  0x93   : > { %1770 = vmatpush1.bf16.msra.mxu1 %v1769_v44  ;;  %973 = vmatmul.mubr.f32.vlgmr.msra.gmra.mrb[16].mxu0 %v333_v45  ;;  %v376_v44 = vld [vmem:[#allocation4 + $0x88] sm:$0xff]  ;;  %v378_v45 = vld [vmem:[#allocation4 + $0x98] sm:$0xff]  ;;  %v1881_v8 = vpack.c.bf16 %v1057_v1, %v1055_v62  ;;  %v1885_v35 = vpack.c.bf16 %v1061_v21, %v1059_v15  ;;  %v302_v62 = vrot.slane %v2568_v11, 1  ;;  %v393_v15 = vld [vmem:[#allocation4 + $0x110] sm:$0xff] }
  0x94   : > { %1866 = vmatpush1.bf16.msra.mxu0 %v1865_v47  ;;  %639 = vmatprep.mubr.f32.mxu1 %v2590_v54  ;;  %v1056_v47 = vld [vmem:[#allocation4 + $0x688] sm:$0xff]  ;;  %v1073_v21 = vld [vmem:[#allocation4 + $0x710] sm:$0xff] }
  0x95   : > { %1772 = vmatprep.subr.bf16.mxu1 %v1771_v55  ;;  %1868 = vmatprep.subr.bf16.mxu0 %v1867_v57  ;;  %v2616_v55 = vsel %vm301_vm0, %v317_v26, %v318_v36  ;;  %v1783_v57 = vpack.c.bf16 %v378_v45, %v376_v44  ;;  %v1879_v63 = vpack.c.bf16 %v1058_v50, %v1056_v47  ;;  %v386_v26 = vld [vmem:[#allocation4 + $0xd8] sm:$0xff]  ;;  %v1065_v45 = vld [vmem:[#allocation4 + $0x6d0] sm:$0xff]  ;;  %v388_v47 = vld [vmem:[#allocation4 + $0xe8] sm:$0xff] }
  0x96   : > { %640 = vmatmul.mubr.f32.gmra.mrb[2].mxu1 %v2493_v43  ;;  %978 = vmatprep.mubr.f32.mxu0 %v2318_v18  ;;  %v371_v43 = vld [vmem:[#allocation4 + $0x60] sm:$0xff]  ;;  %v390_v50 = vld [vmem:[#allocation4 + $0xf8] sm:$0xff] }
  0x97   : > { %1774 = vmatpush1.bf16.msra.mxu1 %v1773_v3  ;;  %645 = vmatprep.mubr.f32.mxu1 %v2596_v46  ;;  %v1781_v52 = vpack.c.bf16 %v373_v34, %v371_v43  ;;  %v382_v3 = vld [vmem:[#allocation4 + $0xb8] sm:$0xff]  ;;  %v461_v34 = vrot.slane %v2560_v49, 1  ;;  %v1068_v49 = vld [vmem:[#allocation4 + $0x6e8] sm:$0xff] }
  0x98   : > { %1870 = vmatpush1.bf16.msra.mxu0 %v1869_v5  ;;  %1776 = vmatprep.subr.bf16.mxu1 %v1775_v7  ;;  %v1785_v5 = vpack.c.bf16 %v377_v61, %v375_v60  ;;  %v2622_v7 = vsel %vm301_vm0, %v318_v36, %v320_v6  ;;  %v1787_v9 = vpack.c.bf16 %v382_v3, %v380_v29  ;;  %v387_v60 = vld [vmem:[#allocation4 + $0xe0] sm:$0xff]  ;;  %v389_v61 = vld [vmem:[#allocation4 + $0xf0] sm:$0xff]  ;;  %v392_v3 = vld [vmem:[#allocation4 + $0x108] sm:$0xff] }
  0x99   : > { %1872 = vmatprep.subr.bf16.mxu0 %v1871_v40  ;;  %979 = vmatmul.mubr.f32.gmra.mrb[18].mxu0 %v335_v51  ;;  %v381_v40 = vld [vmem:[#allocation4 + $0xb0] sm:$0xff]  ;;  %v2632_v36 = vsel %vm301_vm0, %v458_v16, %v459_v19  ;;  %v1070_v51 = vld [vmem:[#allocation4 + $0x6f8] sm:$0xff]  ;;  %v2639_v6 = vsel %vm301_vm0, %v459_v19, %v461_v34  ;;  %v1071_v16 = vld [vmem:[#allocation4 + $0x700] sm:$0xff] }
  0x9a   : > { %646 = vmatmul.mubr.f32.gmra.mrb[4].mxu1 %v2511_v22  ;;  %984 = vmatprep.mubr.f32.mxu0 %v2318_v18  ;;  %v1789_v43 = vpack.c.bf16 %v381_v40, %v379_v10  ;;  %v1891_v1 = vpack.c.bf16 %v1070_v51, %v1068_v49  ;;  %v1069_v29 = vld [vmem:[#allocation4 + $0x6f0] sm:$0xff]  ;;  %v1799_v10 = vpack.c.bf16 %v394_v4, %v392_v3  ;;  %v391_v40 = vld [vmem:[#allocation4 + $0x100] sm:$0xff]  ;;  %v1082_v49 = vld [vmem:[#allocation4 + $0x758] sm:$0xff] }
  0x9b   : > { %1778 = vmatpush1.bf16.msra.mxu1 %v1777_v24  ;;  %651 = vmatprep.mubr.f32.mxu1 %v2602_v25  ;;  %v384_v24 = vld [vmem:[#allocation4 + $0xc8] sm:$0xff]  ;;  %v1897_v34 = vpack.c.bf16 %v1073_v21, %v1071_v16  ;;  %v1086_v4 = vld [vmem:[#allocation4 + $0x778] sm:$0xff]  ;;  %v1085_v16 = vld [vmem:[#allocation4 + $0x770] sm:$0xff] }
  0x9c   : > { %1874 = vmatpush1.bf16.msra.mxu0 %v1873_v30  ;;  %1780 = vmatprep.subr.bf16.mxu1 %v1779_v31  ;;  %v1064_v30 = vld [vmem:[#allocation4 + $0x6c8] sm:$0xff]  ;;  %v1066_v31 = vld [vmem:[#allocation4 + $0x6d8] sm:$0xff]  ;;  %v1791_v37 = vpack.c.bf16 %v386_v26, %v384_v24 }
  0x9d   : > { %1876 = vmatprep.subr.bf16.mxu0 %v1875_v41  ;;  %985 = vmatmul.mubr.f32.gmra.mrb[20].mxu0 %v2508_v12  ;;  %v383_v12 = vld [vmem:[#allocation4 + $0xc0] sm:$0xff]  ;;  %v385_v41 = vld [vmem:[#allocation4 + $0xd0] sm:$0xff]  ;;  %v1887_v44 = vpack.c.bf16 %v1066_v31, %v1064_v30  ;;  %v396_v24 = vld [vmem:[#allocation4 + $0x128] sm:$0xff] }
  0x9e   : > { %652 = vmatmul.mubr.f32.gmra.mrb[6].mxu1 %v2513_v23  ;;  %990 = vmatprep.mubr.f32.mxu0 %v2318_v18  ;;  %v398_v26 = vld [vmem:[#allocation4 + $0x138] sm:$0xff]  ;;  %v1076_v30 = vld [vmem:[#allocation4 + $0x728] sm:$0xff] }
  0x9f   : > { %1782 = vmatpush1.bf16.msra.mxu1 %v1781_v52  ;;  %657 = vmatprep.mubr.f32.mxu1 %v2616_v55  ;;  %v1793_v52 = vpack.c.bf16 %v385_v41, %v383_v12  ;;  %v1078_v31 = vld [vmem:[#allocation4 + $0x738] sm:$0xff]  ;;  %v397_v12 = vld [vmem:[#allocation4 + $0x130] sm:$0xff]  ;;  %v1075_v41 = vld [vmem:[#allocation4 + $0x720] sm:$0xff] }
  0xa0   : > { %1878 = vmatpush1.bf16.msra.mxu0 %v1877_v53  ;;  %1784 = vmatprep.subr.bf16.mxu1 %v1783_v57  ;;  %v1889_v53 = vpack.c.bf16 %v1065_v45, %v1063_v42  ;;  %v1795_v57 = vpack.c.bf16 %v390_v50, %v388_v47  ;;  %v1899_v42 = vpack.c.bf16 %v1078_v31, %v1076_v30  ;;  %v400_v45 = vld [vmem:[#allocation4 + $0x148] sm:$0xff]  ;;  %v402_v47 = vld [vmem:[#allocation4 + $0x158] sm:$0xff] }
  0xa1   : > { %1880 = vmatprep.subr.bf16.mxu0 %v1879_v63  ;;  %991 = vmatmul.mubr.f32.gmra.mrb[22].mxu0 %v2518_v28  ;;  %v1067_v28 = vld [vmem:[#allocation4 + $0x6e0] sm:$0xff]  ;;  %v303_v63 = vrot.slane %v2570_v14, 1  ;;  %v1080_v50 = vld [vmem:[#allocation4 + $0x748] sm:$0xff] }
  0xa2   : > { %658 = vmatmul.mubr.f32.gmra.mrb[8].mxu1 %v2530_v58  ;;  %996 = vmatprep.mubr.f32.mxu0 %v2318_v18  ;;  %v1084_v3 = vld [vmem:[#allocation4 + $0x768] sm:$0xff] }
  0xa3   : > { %1786 = vmatpush1.bf16.msra.mxu1 %v1785_v5  ;;  %663 = vmatprep.mubr.f32.mxu1 %v2622_v7  ;;  %v1074_v5 = vld [vmem:[#allocation4 + $0x718] sm:$0xff]  ;;  %v304_v19 = vsel %vm301_vm0, %v302_v62, %v303_v63  ;;  %v1081_v62 = vld [vmem:[#allocation4 + $0x750] sm:$0xff]  ;;  %v1088_v21 = vld [vmem:[#allocation4 + $0x788] sm:$0xff] }
  0xa4   : > { %1882 = vmatpush1.bf16.msra.mxu0 %v1881_v8  ;;  %1788 = vmatprep.subr.bf16.mxu1 %v1787_v9  ;;  %v1797_v8 = vpack.c.bf16 %v389_v61, %v387_v60  ;;  %v1893_v9 = vpack.c.bf16 %v1069_v29, %v1067_v28  ;;  %v401_v60 = vld [vmem:[#allocation4 + $0x150] sm:$0xff]  ;;  %v1079_v61 = vld [vmem:[#allocation4 + $0x740] sm:$0xff]  ;;  %v1903_v28 = vpack.c.bf16 %v1082_v49, %v1080_v50  ;;  %v406_v29 = vld [vmem:[#allocation4 + $0x178] sm:$0xff] }
  0xa5   : > { %1884 = vmatprep.subr.bf16.mxu0 %v1883_v39  ;;  %997 = vmatmul.mubr.f32.gmra.mrb[24].mxu0 %v2527_v48  ;;  %v1895_v39 = vpack.c.bf16 %v1074_v5, %v1072_v13  ;;  %v1905_v5 = vpack.c.bf16 %v1081_v62, %v1079_v61  ;;  %v416_v61 = vld [vmem:[#allocation4 + $0x1c8] sm:$0xff] }
  0xa6   : > { %664 = vmatmul.mubr.f32.gmra.mrb[10].mxu1 %v2532_v59  ;;  %1002 = vmatprep.mubr.f32.mxu0 %v2318_v18  ;;  %v1096_v62 = vld [vmem:[#allocation4 + $0x7c8] sm:$0xff] }
  0xa7   : > { %1790 = vmatpush1.bf16.msra.mxu1 %v1789_v43  ;;  %669 = vmatprep.mubr.f32.mxu1 %v2632_v36  ;;  %v1801_v43 = vpack.c.bf16 %v393_v15, %v391_v40  ;;  %v1083_v40 = vld [vmem:[#allocation4 + $0x760] sm:$0xff]  ;;  %v1907_v15 = vpack.c.bf16 %v1086_v4, %v1084_v3 }
  0xa8   : > { %1886 = vmatpush1.bf16.msra.mxu0 %v1885_v35  ;;  %1792 = vmatprep.subr.bf16.mxu1 %v1791_v37  ;;  %v1803_v35 = vpack.c.bf16 %v398_v26, %v396_v24  ;;  %v395_v37 = vld [vmem:[#allocation4 + $0x120] sm:$0xff]  ;;  %v1090_v24 = vld [vmem:[#allocation4 + $0x798] sm:$0xff]  ;;  %v1909_v30 = vpack.c.bf16 %v1085_v16, %v1083_v40  ;;  %v420_v40 = vld [vmem:[#allocation4 + $0x1e8] sm:$0xff] }
  0xa9   : > { %1888 = vmatprep.subr.bf16.mxu0 %v1887_v44  ;;  %1003 = vmatmul.mubr.f32.gmra.mrb[26].mxu0 %v2537_v0  ;;  %v1077_v44 = vld [vmem:[#allocation4 + $0x730] sm:$0xff]  ;;  %v1805_v51 = vpack.c.bf16 %v397_v12, %v395_v37  ;;  %v1911_v37 = vpack.c.bf16 %v1090_v24, %v1088_v21  ;;  %v1100_v16 = vld [vmem:[#allocation4 + $0x7e8] sm:$0xff] }
  0xaa   : > { %670 = vmatmul.mubr.f32.gmra.mrb[12].mxu1 %v2549_v32  ;;  %1008 = vmatprep.mubr.f32.mxu0 %v2318_v18  ;;  %v1089_v12 = vld [vmem:[#allocation4 + $0x790] sm:$0xff] }
  0xab   : > { %1794 = vmatpush1.bf16.msra.mxu1 %v1793_v52  ;;  %675 = vmatprep.mubr.f32.mxu1 %v2639_v6  ;;  %v1901_v52 = vpack.c.bf16 %v1077_v44, %v1075_v41  ;;  %v412_v41 = vld [vmem:[#allocation4 + $0x1a8] sm:$0xff] }
  0xac   : > { %1890 = vmatpush1.bf16.msra.mxu0 %v1889_v53  ;;  %1796 = vmatprep.subr.bf16.mxu1 %v1795_v57  ;;  %v1807_v53 = vpack.c.bf16 %v402_v47, %v400_v45  ;;  %v399_v57 = vld [vmem:[#allocation4 + $0x140] sm:$0xff]  ;;  %v1092_v44 = vld [vmem:[#allocation4 + $0x7a8] sm:$0xff]  ;;  %v1094_v45 = vld [vmem:[#allocation4 + $0x7b8] sm:$0xff] }
  0xad   : > { %1892 = vmatprep.subr.bf16.mxu0 %v1891_v1  ;;  %1009 = vmatmul.mubr.f32.gmra.mrb[28].mxu0 %v2546_v20  ;;  %v404_v1 = vld [vmem:[#allocation4 + $0x168] sm:$0xff]  ;;  %v1809_v13 = vpack.c.bf16 %v401_v60, %v399_v57  ;;  %v1915_v57 = vpack.c.bf16 %v1094_v45, %v1092_v44  ;;  %v1093_v60 = vld [vmem:[#allocation4 + $0x7b0] sm:$0xff]  ;;  %v1103_v44 = vld [vmem:[#allocation4 + $0x800] sm:$0xff] }
  0xae   : > { %676 = vmatmul.mubr.f32.gmra.mrb[14].mxu1 %v2551_v33  ;;  %1014 = vmatprep.mubr.f32.mxu0 %v2318_v18  ;;  %v1105_v45 = vld [vmem:[#allocation4 + $0x810] sm:$0xff] }
  0xaf   : > { %1798 = vmatpush1.bf16.msra.mxu1 %v1797_v8  ;;  %859 = vmatprep.mubr.f32.mxu1 %v304_v19  ;;  %v1811_v8 = vpack.c.bf16 %v406_v29, %v404_v1  ;;  %v408_v19 = vld [vmem:[#allocation4 + $0x188] sm:$0xff]  ;;  %v1098_v1 = vld [vmem:[#allocation4 + $0x7d8] sm:$0xff] }
  0xb0   : > { %1894 = vmatpush1.bf16.msra.mxu0 %v1893_v9  ;;  %1800 = vmatprep.subr.bf16.mxu1 %v1799_v10  ;;  %v403_v9 = vld [vmem:[#allocation4 + $0x160] sm:$0xff]  ;;  %v405_v10 = vld [vmem:[#allocation4 + $0x170] sm:$0xff] }
  0xb1   : > { %1896 = vmatprep.subr.bf16.mxu0 %v1895_v39  ;;  %1015 = vmatmul.mubr.f32.gmra.mrb[30].mxu0 %v2556_v38  ;;  %v410_v39 = vld [vmem:[#allocation4 + $0x198] sm:$0xff]  ;;  %v1813_v26 = vpack.c.bf16 %v405_v10, %v403_v9  ;;  %v1919_v9 = vpack.c.bf16 %v1098_v1, %v1096_v62  ;;  %v1097_v10 = vld [vmem:[#allocation4 + $0x7d0] sm:$0xff]  ;;  %v1111_v62 = vld [vmem:[#allocation4 + $0x840] sm:$0xff] }
  0xb2   : > { %1199 = vmatprep.mubr.f32.mxu0 %v2596_v46  ;;  %v1815_v31 = vpack.c.bf16 %v410_v39, %v408_v19  ;;  %v1102_v19 = vld [vmem:[#allocation4 + $0x7f8] sm:$0xff]  ;;  %v1113_v1 = vld [vmem:[#allocation4 + $0x850] sm:$0xff] }
  0xb3   : > { %1802 = vmatpush1.bf16.msra.mxu1 %v1801_v43  ;;  %v407_v43 = vld [vmem:[#allocation4 + $0x180] sm:$0xff] }
  0xb4   : > { %1898 = vmatpush1.bf16.msra.mxu0 %v1897_v34  ;;  %1804 = vmatprep.subr.bf16.mxu1 %v1803_v35  ;;  %v409_v34 = vld [vmem:[#allocation4 + $0x190] sm:$0xff]  ;;  %v1087_v35 = vld [vmem:[#allocation4 + $0x780] sm:$0xff] }
  0xb5   : > { %1900 = vmatprep.subr.bf16.mxu0 %v1899_v42  ;;  %v414_v42 = vld [vmem:[#allocation4 + $0x1b8] sm:$0xff]  ;;  %v1817_v47 = vpack.c.bf16 %v409_v34, %v407_v43  ;;  %v1913_v50 = vpack.c.bf16 %v1089_v12, %v1087_v35  ;;  %v1923_v43 = vpack.c.bf16 %v1102_v19, %v1100_v16  ;;  %v1101_v34 = vld [vmem:[#allocation4 + $0x7f0] sm:$0xff]  ;;  %v1104_v35 = vld [vmem:[#allocation4 + $0x808] sm:$0xff] }
  0xb6   : > { %v1819_v49 = vpack.c.bf16 %v414_v42, %v412_v41  ;;  %v1126_v16 = vld [vmem:[#allocation4 + $0x8b8] sm:$0xff]  ;;  %v2672_v19 = vld [vmem:[#allocation2 + $0x78] sm:$0xff] }
  0xb7   : > { %1806 = vmatpush1.bf16.msra.mxu1 %v1805_v51  ;;  %v411_v51 = vld [vmem:[#allocation4 + $0x1a0] sm:$0xff] }
  0xb8   : > { %1902 = vmatpush1.bf16.msra.mxu0 %v1901_v52  ;;  %1808 = vmatprep.subr.bf16.mxu1 %v1807_v53  ;;  %v413_v52 = vld [vmem:[#allocation4 + $0x1b0] sm:$0xff]  ;;  %v1091_v53 = vld [vmem:[#allocation4 + $0x7a0] sm:$0xff] }
  0xb9   : > { %1904 = vmatprep.subr.bf16.mxu0 %v1903_v28  ;;  %v418_v28 = vld [vmem:[#allocation4 + $0x1d8] sm:$0xff]  ;;  %v1821_v29 = vpack.c.bf16 %v413_v52, %v411_v51  ;;  %v1917_v3 = vpack.c.bf16 %v1093_v60, %v1091_v53  ;;  %v1929_v51 = vpack.c.bf16 %v1105_v45, %v1103_v44  ;;  %v1107_v52 = vld [vmem:[#allocation4 + $0x820] sm:$0xff]  ;;  %v1109_v53 = vld [vmem:[#allocation4 + $0x830] sm:$0xff] }
  0xba   : > { %v1823_v4 = vpack.c.bf16 %v418_v28, %v416_v61  ;;  %v1112_v61 = vld [vmem:[#allocation4 + $0x848] sm:$0xff]  ;;  %v1114_v28 = vld [vmem:[#allocation4 + $0x858] sm:$0xff] }
  0xbb   : > { %1810 = vmatpush1.bf16.msra.mxu1 %v1809_v13  ;;  %v415_v13 = vld [vmem:[#allocation4 + $0x1c0] sm:$0xff]  ;;  %v1132_v44 = vld [vmem:[#allocation4 + $0x8e8] sm:$0xff] }
  0xbc   : > { %1906 = vmatpush1.bf16.msra.mxu0 %v1905_v5  ;;  %1812 = vmatprep.subr.bf16.mxu1 %v1811_v8  ;;  %v417_v5 = vld [vmem:[#allocation4 + $0x1d0] sm:$0xff]  ;;  %v1095_v8 = vld [vmem:[#allocation4 + $0x7c0] sm:$0xff] }
  0xbd   : > { %1908 = vmatprep.subr.bf16.mxu0 %v1907_v15  ;;  %v422_v15 = vld [vmem:[#allocation4 + $0x1f8] sm:$0xff]  ;;  %v1825_v39 = vpack.c.bf16 %v417_v5, %v415_v13  ;;  %v1921_v21 = vpack.c.bf16 %v1097_v10, %v1095_v8  ;;  %v2147_v5 = vld [vmem:[#allocation2 + $0x18] sm:$0xff] }
  0xbe   : > { %v1827_v24 = vpack.c.bf16 %v422_v15, %v420_v40  ;;  %v1122_v8 = vld [vmem:[#allocation4 + $0x898] sm:$0xff]  ;;  %v2148_v40 = vld [vmem:[#allocation2 + $0x20] sm:$0xff]  ;;  %v1124_v15 = vld [vmem:[#allocation4 + $0x8a8] sm:$0xff] }
  0xbf   : > { %1814 = vmatpush1.bf16.msra.mxu1 %v1813_v26  ;;  %v419_v26 = vld [vmem:[#allocation4 + $0x1e0] sm:$0xff] }
  0xc0   : > { %1910 = vmatpush1.bf16.msra.mxu0 %v1909_v30  ;;  %1816 = vmatprep.subr.bf16.mxu1 %v1815_v31  ;;  %v421_v30 = vld [vmem:[#allocation4 + $0x1f0] sm:$0xff]  ;;  %v1099_v31 = vld [vmem:[#allocation4 + $0x7e0] sm:$0xff] }
  0xc1   : > { %1912 = vmatprep.subr.bf16.mxu0 %v1911_v37  ;;  %v1106_v37 = vld [vmem:[#allocation4 + $0x818] sm:$0xff]  ;;  %v1829_v12 = vpack.c.bf16 %v421_v30, %v419_v26  ;;  %v1925_v41 = vpack.c.bf16 %v1101_v34, %v1099_v31  ;;  %v2149_v26 = vld [vmem:[#allocation2 + $0x30] sm:$0xff]  ;;  %v1128_v31 = vld [vmem:[#allocation4 + $0x8c8] sm:$0xff] }
  0xc2   : > { %v1927_v42 = vpack.c.bf16 %v1106_v37, %v1104_v35  ;;  %v1129_v35 = vld [vmem:[#allocation4 + $0x8d0] sm:$0xff] }
  0xc3   : > { %1818 = vmatpush1.bf16.msra.mxu1 %v1817_v47  ;;  %v305_v47 = vrot.slane %v2605_v27, 1  ;;  %v1933_v27 = vpack.c.bf16 %v1109_v53, %v1107_v52 }
  0xc4   : > { %1914 = vmatpush1.bf16.msra.mxu0 %v1913_v50  ;;  %1820 = vmatprep.subr.bf16.mxu1 %v1819_v49  ;;  %v1108_v50 = vld [vmem:[#allocation4 + $0x828] sm:$0xff]  ;;  %v1110_v49 = vld [vmem:[#allocation4 + $0x838] sm:$0xff] }
  0xc5   : > { %1916 = vmatprep.subr.bf16.mxu0 %v1915_v57  ;;  %v306_v57 = vsel %vm301_vm0, %v303_v63, %v305_v47  ;;  %v1931_v60 = vpack.c.bf16 %v1110_v49, %v1108_v50  ;;  %v1116_v63 = vld [vmem:[#allocation4 + $0x868] sm:$0xff]  ;;  %v1133_v47 = vld [vmem:[#allocation4 + $0x8f0] sm:$0xff]  ;;  %v2151_v50 = vld [vmem:[#allocation2 + $0x48] sm:$0xff] }
  0xc7   : > { %1822 = vmatpush1.bf16.msra.mxu1 %v1821_v29  ;;  %v1935_v29 = vpack.c.bf16 %v1114_v28, %v1112_v61 }
  0xc8   : > { %1918 = vmatpush1.bf16.msra.mxu0 %v1917_v3  ;;  %1824 = vmatprep.subr.bf16.mxu1 %v1823_v4  ;;  %v1118_v3 = vld [vmem:[#allocation4 + $0x878] sm:$0xff]  ;;  %v1117_v4 = vld [vmem:[#allocation4 + $0x870] sm:$0xff] }
  0xc9   : > { %1920 = vmatprep.subr.bf16.mxu0 %v1919_v9  ;;  %v1939_v13 = vpack.c.bf16 %v1118_v3, %v1116_v63  ;;  %v1119_v9 = vld [vmem:[#allocation4 + $0x880] sm:$0xff] }
  0xcb   : > { %1826 = vmatpush1.bf16.msra.mxu1 %v1825_v39  ;;  %v2674_v39 = vld [vmem:[#allocation2 + $0x80] sm:$0xff] }
  0xcc   : > { %1922 = vmatpush1.bf16.msra.mxu0 %v1921_v21  ;;  %1828 = vmatprep.subr.bf16.mxu1 %v1827_v24  ;;  %v1125_v21 = vld [vmem:[#allocation4 + $0x8b0] sm:$0xff]  ;;  %v1947_v24 = vpack.c.bf16 %v1126_v16, %v1124_v15  ;;  %v1025_v30 = vrot.slane %v2674_v39, 1 }
  0xcd   : > { %1924 = vmatprep.subr.bf16.mxu0 %v1923_v43  ;;  %v1130_v43 = vld [vmem:[#allocation4 + $0x8d8] sm:$0xff] }
  0xce   : > { %v1951_v37 = vpack.c.bf16 %v1130_v43, %v1128_v31 }
  0xcf   : > { %1830 = vmatpush1.bf16.msra.mxu1 %v1829_v12  ;;  %v2150_v12 = vld [vmem:[#allocation2 + $0x38] sm:$0xff] }
  0xd0   : > { %1926 = vmatpush1.bf16.msra.mxu0 %v1925_v41  ;;  %1959 = vmatprep.subr.bf16.mxu1 %v1927_v42 }
  0xd1   : > { %1928 = vmatprep.subr.bf16.mxu0 %v1927_v42 }
  0xd2   : > { %860 = vmatmul.mubr.f32.vlgmr.msra.gmra.mrb[16].mxu1 %v2568_v11  ;;  %v1937_v11 = vpack.c.bf16 %v1113_v1, %v1111_v62 }
  0xd3   : > { %1200 = vmatmul.mubr.f32.vlgmr.msra.gmra.mrb[16].mxu0 %v2511_v22  ;;  %1967 = vmatpush1.bf16.msra.mxu1 %v1929_v51  ;;  %v1115_v22 = vld [vmem:[#allocation4 + $0x860] sm:$0xff] }
  0xd4   : > { %1930 = vmatpush1.bf16.msra.mxu0 %v1929_v51  ;;  %865 = vmatprep.mubr.f32.mxu1 %v306_v57 }
  0xd5   : > { %1205 = vmatprep.mubr.f32.mxu0 %v2602_v25  ;;  %1932 = vmatprep.subr.bf16.mxu0 %v1931_v60 }
  0xd6   : > { %866 = vmatmul.mubr.f32.gmra.mrb[18].mxu1 %v2570_v14  ;;  %1960 = vmatprep.subr.bf16.mxu1 %v1931_v60  ;;  %v1120_v14 = vld [vmem:[#allocation4 + $0x888] sm:$0xff] }
  0xd7   : > { %1206 = vmatmul.mubr.f32.gmra.mrb[18].mxu0 %v2513_v23  ;;  %1968 = vmatpush1.bf16.msra.mxu1 %v1933_v27  ;;  %v1941_v23 = vpack.c.bf16 %v1117_v4, %v1115_v22  ;;  %v1943_v10 = vpack.c.bf16 %v1122_v8, %v1120_v14 }
  0xd8   : > { %1934 = vmatpush1.bf16.msra.mxu0 %v1933_v27  ;;  %871 = vmatprep.mubr.f32.mxu1 %v2500_v56  ;;  %v1121_v56 = vld [vmem:[#allocation4 + $0x890] sm:$0xff] }
  0xd9   : > { %1211 = vmatprep.mubr.f32.mxu0 %v2616_v55  ;;  %1936 = vmatprep.subr.bf16.mxu0 %v1935_v29 }
  0xda   : > { %872 = vmatmul.mubr.f32.gmra.mrb[20].mxu1 %v2147_v5  ;;  %1961 = vmatprep.subr.bf16.mxu1 %v1935_v29 }
  0xdb   : > { %1212 = vmatmul.mubr.f32.gmra.mrb[20].mxu0 %v2530_v58  ;;  %1969 = vmatpush1.bf16.msra.mxu1 %v1937_v11  ;;  %v1945_v58 = vpack.c.bf16 %v1121_v56, %v1119_v9 }
  0xdc   : > { %1938 = vmatpush1.bf16.msra.mxu0 %v1937_v11  ;;  %877 = vmatprep.mubr.f32.mxu1 %v2590_v54  ;;  %v1123_v54 = vld [vmem:[#allocation4 + $0x8a0] sm:$0xff] }
  0xdd   : > { %1217 = vmatprep.mubr.f32.mxu0 %v2622_v7  ;;  %1940 = vmatprep.subr.bf16.mxu0 %v1939_v13  ;;  %v1949_v34 = vpack.c.bf16 %v1125_v21, %v1123_v54 }
  0xde   : > { %878 = vmatmul.mubr.f32.gmra.mrb[22].mxu1 %v2148_v40  ;;  %1962 = vmatprep.subr.bf16.mxu1 %v1939_v13 }
  0xdf   : > { %1218 = vmatmul.mubr.f32.gmra.mrb[22].mxu0 %v2532_v59  ;;  %1970 = vmatpush1.bf16.msra.mxu1 %v1941_v23  ;;  %v1024_v59 = vrot.slane %v2672_v19, 1 }
  0xe0   : > { %1942 = vmatpush1.bf16.msra.mxu0 %v1941_v23  ;;  %883 = vmatprep.mubr.f32.mxu1 %v2596_v46  ;;  %v288_v46 = vld [vmem:[#allocation2 + $0x88] sm:$0x3] }
  0xe1   : > { %1223 = vmatprep.mubr.f32.mxu0 %v2632_v36  ;;  %1944 = vmatprep.subr.bf16.mxu0 %v1943_v10  ;;  %v1127_v36 = vld [vmem:[#allocation4 + $0x8c0] sm:$0xff]  ;;  %v1026_v41 = vsel %vm301_vm0, %v1024_v59, %v1025_v30  ;;  %v1027_v42 = vrot.slane %v288_v46, 1  ;;  %v1034_v53 = vrot.slane %v288_v46, 2 }
  0xe2   : > { %884 = vmatmul.mubr.f32.gmra.mrb[24].mxu1 %v2149_v26  ;;  %1963 = vmatprep.subr.bf16.mxu1 %v1943_v10  ;;  %v1953_v45 = vpack.c.bf16 %v1129_v35, %v1127_v36 }
  0xe3   : > { %1224 = vmatmul.mubr.f32.gmra.mrb[24].mxu0 %v2549_v32  ;;  %1971 = vmatpush1.bf16.msra.mxu1 %v1945_v58  ;;  %v1134_v32 = vld [vmem:[#allocation4 + $0x8f8] sm:$0xff]  ;;  %v1028_v49 = vsel %vm301_vm0, %v1025_v30, %v1027_v42 }
  0xe4   : > { %1946 = vmatpush1.bf16.msra.mxu0 %v1945_v58  ;;  %889 = vmatprep.mubr.f32.mxu1 %v2602_v25  ;;  %v1131_v25 = vld [vmem:[#allocation4 + $0x8e0] sm:$0xff] }
  0xe5   : > { %1229 = vmatprep.mubr.f32.mxu0 %v2639_v6  ;;  %1948 = vmatprep.subr.bf16.mxu0 %v1947_v24  ;;  %v1955_v6 = vpack.c.bf16 %v1134_v32, %v1132_v44  ;;  %v1957_v51 = vpack.c.bf16 %v1133_v47, %v1131_v25 }
  0xe6   : > { %890 = vmatmul.mubr.f32.gmra.mrb[26].mxu1 %v2150_v12  ;;  %1964 = vmatprep.subr.bf16.mxu1 %v1947_v24 }
  0xe7   : > { %1230 = vmatmul.mubr.f32.gmra.mrb[26].mxu0 %v2551_v33  ;;  %1972 = vmatpush1.bf16.msra.mxu1 %v1949_v34  ;;  %v2152_v33 = vld [vmem:[#allocation2 + $0x50] sm:$0xff] }
  0xe8   : > { %1950 = vmatpush1.bf16.msra.mxu0 %v1949_v34  ;;  %895 = vmatprep.mubr.f32.mxu1 %v2616_v55  ;;  %v1031_v55 = vrot.slane %v2672_v19, 2 }
  0xe9   : > { %1235 = vmatprep.mubr.f32.mxu0 %v1026_v41  ;;  %1952 = vmatprep.subr.bf16.mxu0 %v1951_v37 }
  0xea   : > { %896 = vmatmul.mubr.f32.gmra.mrb[28].mxu1 %v2151_v50  ;;  %1965 = vmatprep.subr.bf16.mxu1 %v1951_v37 }
  0xeb   : > { %1236 = vmatmul.mubr.f32.gmra.mrb[28].mxu0 %v2672_v19  ;;  %1973 = vmatpush1.bf16.msra.mxu1 %v1953_v45 }
  0xec   : > { %1954 = vmatpush1.bf16.msra.mxu0 %v1953_v45  ;;  %901 = vmatprep.mubr.f32.mxu1 %v2622_v7  ;;  %v1032_v7 = vrot.slane %v2674_v39, 2 }
  0xed   : > { %1241 = vmatprep.mubr.f32.mxu0 %v1028_v49  ;;  %1956 = vmatprep.subr.bf16.mxu0 %v1955_v6 }
  0xee   : > { %902 = vmatmul.mubr.f32.gmra.mrb[30].mxu1 %v2152_v33  ;;  %1966 = vmatprep.subr.bf16.mxu1 %v1955_v6  ;;  %v1033_v52 = vsel %vm330_vm1, %v1031_v55, %v1032_v7 }
  0xef   : > { %1242 = vmatmul.mubr.f32.gmra.mrb[30].mxu0 %v2674_v39  ;;  %1974 = vmatpush1.bf16.msra.mxu1 %v1957_v51 }
  0xf0   : > { %1958 = vmatpush1.bf16.msra.mxu0 %v1957_v51  ;;  %1312 = vmatprep.mubr.f32.mxu0 %v2318_v18 }
  0xf1   : > { %1336 = vmatprep.mubr.f32.mxu1 %v2318_v18 }
  0xf2   : > { %1337 = vmatmul.mubr.f32.vlgmr.msra.gmra.mrb[32].mxu1 %v2566_v2 }
  0xf3   : > { %1313 = vmatmul.mubr.f32.vlgmr.msra.gmra.mrb[16].mxu0 %v2527_v48  ;;  %1342 = vmatprep.mubr.f32.mxu1 %v2318_v18  ;;  %v1035_v48 = vsel %vm330_vm1, %v1032_v7, %v1034_v53 }
  0xf4   : > { %1318 = vmatprep.mubr.f32.mxu0 %v2318_v18 }
  0xf6   : > { %1343 = vmatmul.mubr.f32.gmra.mrb[34].mxu1 %v2574_v17 }
  0xf7   : > { %1319 = vmatmul.mubr.f32.gmra.mrb[18].mxu0 %v2537_v0  ;;  %1348 = vmatprep.mubr.f32.mxu1 %v2318_v18 }
  0xf8   : > { %1324 = vmatprep.mubr.f32.mxu0 %v2318_v18 }
  0xfa   : > { %1349 = vmatmul.mubr.f32.gmra.mrb[36].mxu1 %v1033_v52 }
  0xfb   : > { %1325 = vmatmul.mubr.f32.gmra.mrb[20].mxu0 %v2546_v20  ;;  %1354 = vmatprep.mubr.f32.mxu1 %v2318_v18 }
  0xfc   : > { %1330 = vmatprep.mubr.f32.mxu0 %v2318_v18 }
  0xfe   : > { %1355 = vmatmul.mubr.f32.gmra.mrb[38].mxu1 %v1035_v48 }
  0xff   : > { %1331 = vmatmul.mubr.f32.gmra.mrb[22].mxu0 %v2556_v38 }
 0x146   : > { %v748_v0 = vpop.f32.mrb[0].mxu0 }
 0x147   : > { %v750_v2 = vpop.f32.mrb[1].mxu0 }
 0x14a   : > { %v754_v17 = vpop.f32.mrb[2].mxu0 }
 0x14b   : > { %v756_v57 = vpop.f32.mrb[3].mxu0 }
 0x14e   : > { %v760_v60 = vpop.f32.mrb[4].mxu0 }
 0x14f   : > { %v762_v61 = vpop.f32.mrb[5].mxu0 }
 0x152   : > { %v766_v28 = vpop.f32.mrb[6].mxu0 }
 0x153   : > { %v768_v27 = vpop.f32.mrb[7].mxu0 }
 0x156   : > { %v772_v62 = vpop.f32.mrb[8].mxu0 }
 0x157   : > { %v774_v1 = vpop.f32.mrb[9].mxu0 }
 0x15a   : > { %v778_v20 = vpop.f32.mrb[10].mxu0 }
 0x15b   : > { %v780_v29 = vpop.f32.mrb[11].mxu0 }
 0x15e   : > { %v784_v63 = vpop.f32.mrb[12].mxu0 }
 0x15f   : > { %v786_v3 = vpop.f32.mrb[13].mxu0 }
 0x162   : > { %v790_v11 = vpop.f32.mrb[14].mxu0 }
 0x163   : > { %v792_v22 = vpop.f32.mrb[15].mxu0 }
 0x165   : > { %v635_v18 = vpop.f32.mrb[0].mxu1 }
 0x166   : > { %v749_v4 = vadd.f32 %v748_v0, %v635_v18  ;;  %v637_v13 = vpop.f32.mrb[1].mxu1 }
 0x167   : > { %v751_v38 = vadd.f32 %v750_v2, %v637_v13 }
 0x169   : > { %v641_v5 = vpop.f32.mrb[2].mxu1 }
 0x16a   : > { %v755_v14 = vadd.f32 %v754_v17, %v641_v5  ;;  %v643_v8 = vpop.f32.mrb[3].mxu1 }
 0x16b   : > { %v757_v23 = vadd.f32 %v756_v57, %v643_v8 }
 0x16d   : > { %v647_v9 = vpop.f32.mrb[4].mxu1 }
 0x16e   : > { %v761_v56 = vadd.f32 %v760_v60, %v647_v9  ;;  %v649_v10 = vpop.f32.mrb[5].mxu1 }
 0x16f   : > { %v763_v40 = vadd.f32 %v762_v61, %v649_v10 }
 0x171   : > { %v653_v15 = vpop.f32.mrb[6].mxu1 }
 0x172   : > { %v767_v16 = vadd.f32 %v766_v28, %v653_v15  ;;  %v655_v58 = vpop.f32.mrb[7].mxu1 }
 0x173   : > { %v769_v19 = vadd.f32 %v768_v27, %v655_v58 }
 0x175   : > { %v659_v39 = vpop.f32.mrb[8].mxu1 }
 0x176   : > { %v773_v54 = vadd.f32 %v772_v62, %v659_v39  ;;  %v661_v21 = vpop.f32.mrb[9].mxu1 }
 0x177   : > { %v775_v24 = vadd.f32 %v774_v1, %v661_v21 }
 0x179   : > { %v665_v26 = vpop.f32.mrb[10].mxu1 }
 0x17a   : > { %v779_v59 = vadd.f32 %v778_v20, %v665_v26  ;;  %v667_v30 = vpop.f32.mrb[11].mxu1 }
 0x17b   : > { %v781_v31 = vadd.f32 %v780_v29, %v667_v30 }
 0x17d   : > { %v671_v43 = vpop.f32.mrb[12].mxu1 }
 0x17e   : > { %v785_v34 = vadd.f32 %v784_v63, %v671_v43  ;;  %v673_v46 = vpop.f32.mrb[13].mxu1 }
 0x17f   : > { %v787_v36 = vadd.f32 %v786_v3, %v673_v46 }
 0x181   : > { %v677_v35 = vpop.f32.mrb[14].mxu1 }
 0x182   : > { %v791_v37 = vadd.f32 %v790_v11, %v677_v35  ;;  %v679_v12 = vpop.f32.mrb[15].mxu1 }
 0x183   : > { %v793_v41 = vadd.f32 %v792_v22, %v679_v12 }
 0x1a5   : > { %v861_v42 = vpop.f32.mrb[16].mxu1 }
 0x1a6   : > { %v862_v44 = vadd.f32 %v861_v42, %v749_v4  ;;  %v863_v32 = vpop.f32.mrb[17].mxu1 }
 0x1a7   : > { %v864_v45 = vadd.f32 %v863_v32, %v751_v38 }
 0x1a9   : > { %v867_v25 = vpop.f32.mrb[18].mxu1 }
 0x1aa   : > { %v868_v47 = vadd.f32 %v867_v25, %v755_v14  ;;  %v869_v6 = vpop.f32.mrb[19].mxu1 }
 0x1ab   : > { %v2708_v50 = vadd.f32 %v869_v6, %v757_v23 }
 0x1ad   : > { %v873_v49 = vpop.f32.mrb[20].mxu1 }
 0x1ae   : > { %v2710_v51 = vadd.f32 %v873_v49, %v761_v56  ;;  %v875_v33 = vpop.f32.mrb[21].mxu1 }
 0x1af   : > { %v2712_v55 = vadd.f32 %v875_v33, %v763_v40 }
 0x1b1   : > { %v879_v7 = vpop.f32.mrb[22].mxu1 }
 0x1b2   : > { %v2714_v52 = vadd.f32 %v879_v7, %v767_v16  ;;  %v881_v53 = vpop.f32.mrb[23].mxu1 }
 0x1b3   : > { %v2716_v48 = vadd.f32 %v881_v53, %v769_v19 }
 0x1b5   : > { %v885_v0 = vpop.f32.mrb[24].mxu1 }
 0x1b6   : > { %v886_v2 = vadd.f32 %v885_v0, %v773_v54  ;;  %v1225_v17 = vpop.f32.mrb[24].mxu0  ;;  %v887_v57 = vpop.f32.mrb[25].mxu1 }
 0x1b7   : > { %v888_v60 = vadd.f32 %v887_v57, %v775_v24  ;;  %v1227_v61 = vpop.f32.mrb[25].mxu0 }
 0x1b8   : > { %v2001_v28 = vadd.f32 %v1225_v17, %v886_v2 }
 0x1b9   : > { %v2005_v27 = vadd.f32 %v1227_v61, %v888_v60  ;;  %v891_v62 = vpop.f32.mrb[26].mxu1 }
 0x1ba   : > { %v892_v1 = vadd.f32 %v891_v62, %v779_v59  ;;  %v1231_v20 = vpop.f32.mrb[26].mxu0  ;;  %v893_v29 = vpop.f32.mrb[27].mxu1 }
 0x1bb   : > { %v894_v63 = vadd.f32 %v893_v29, %v781_v31  ;;  %v1233_v3 = vpop.f32.mrb[27].mxu0 }
 0x1bc   : > { %v2009_v11 = vadd.f32 %v1231_v20, %v892_v1 }
 0x1bd   : > { %v2013_v22 = vadd.f32 %v1233_v3, %v894_v63  ;;  %v897_v18 = vpop.f32.mrb[28].mxu1 }
 0x1be   : > { %v898_v4 = vadd.f32 %v897_v18, %v785_v34  ;;  %v1237_v13 = vpop.f32.mrb[28].mxu0  ;;  %v899_v38 = vpop.f32.mrb[29].mxu1 }
 0x1bf   : > { %v900_v5 = vadd.f32 %v899_v38, %v787_v36  ;;  %v1239_v14 = vpop.f32.mrb[29].mxu0 }
 0x1c0   : > { %v2017_v8 = vadd.f32 %v1237_v13, %v898_v4 }
 0x1c1   : > { %v2021_v23 = vadd.f32 %v1239_v14, %v900_v5  ;;  %v903_v9 = vpop.f32.mrb[30].mxu1 }
 0x1c2   : > { %v904_v56 = vadd.f32 %v903_v9, %v791_v37  ;;  %v1243_v10 = vpop.f32.mrb[30].mxu0  ;;  %v905_v40 = vpop.f32.mrb[31].mxu1 }
 0x1c3   : > { %v906_v15 = vadd.f32 %v905_v40, %v793_v41  ;;  %v1245_v16 = vpop.f32.mrb[31].mxu0 }
 0x1c4   : > { %v2025_v58 = vadd.f32 %v1243_v10, %v904_v56 }
 0x1c5   : > { %v2029_v19 = vadd.f32 %v1245_v16, %v906_v15  ;;  %v1338_v39 = vpop.f32.mrb[32].mxu1 }
 0x1c6   : > { %v1314_v54 = vpop.f32.mrb[16].mxu0  ;;  %v2718_v21 = vadd.f32 %v2001_v28, %v1338_v39  ;;  %v1340_v24 = vpop.f32.mrb[33].mxu1 }
 0x1c7   : > { %v1977_v26 = vadd.f32 %v1314_v54, %v862_v44  ;;  %v1316_v59 = vpop.f32.mrb[17].mxu0  ;;  %v2720_v30 = vadd.f32 %v2005_v27, %v1340_v24 }
 0x1c8   : > { %1385 = vst [vmem:[%s2484_s4 + $0x40] sm:$0xff] %v2718_v21  ;;  %v1980_v31 = vadd.f32 %v1316_v59, %v864_v45  ;;  %v1427_v38 = vmul.f32 %v2718_v21, %v2718_v21 }
 0x1c9   : > { %1377 = vst [vmem:[%s2484_s4] sm:$0xff] %v1977_v26  ;;  %1386 = vst [vmem:[%s2484_s4 + $0x48] sm:$0xff] %v2720_v30  ;;  %v1344_v43 = vpop.f32.mrb[34].mxu1  ;;  %v1419_v42 = vmul.f32 %v1977_v26, %v1977_v26 }
 0x1ca   : > { %1378 = vst [vmem:[%s2484_s4 + $0x8] sm:$0xff] %v1980_v31  ;;  %v1320_v34 = vpop.f32.mrb[18].mxu0  ;;  %v2728_v46 = vadd.f32 %v2009_v11, %v1344_v43  ;;  %v1346_v36 = vpop.f32.mrb[35].mxu1  ;;  %v1420_v25 = vmul.f32 %v1980_v31, %v1980_v31 }
 0x1cb   : > { %v1983_v35 = vadd.f32 %v1320_v34, %v868_v47  ;;  %v1322_v37 = vpop.f32.mrb[19].mxu0  ;;  %v2730_v12 = vadd.f32 %v2013_v22, %v1346_v36 }
 0x1cc   : > { %1387 = vst [vmem:[%s2484_s4 + $0x50] sm:$0xff] %v2728_v46  ;;  %v1986_v41 = vadd.f32 %v1322_v37, %v2708_v50 }
 0x1cd   : > { %1379 = vst [vmem:[%s2484_s4 + $0x10] sm:$0xff] %v1983_v35  ;;  %v1393_v44 = vadd.f32 %v1983_v35, %v1977_v26  ;;  %v1421_v32 = vmul.f32 %v1983_v35, %v1983_v35  ;;  %1388 = vst [vmem:[%s2484_s4 + $0x58] sm:$0xff] %v2730_v12  ;;  %v1350_v45 = vpop.f32.mrb[36].mxu1 }
 0x1ce   : > { %1380 = vst [vmem:[%s2484_s4 + $0x18] sm:$0xff] %v1986_v41  ;;  %v1406_v47 = vadd.f32 %v1986_v41, %v1980_v31  ;;  %v1422_v6 = vmul.f32 %v1986_v41, %v1986_v41  ;;  %v1326_v49 = vpop.f32.mrb[20].mxu0  ;;  %v2741_v33 = vadd.f32 %v2017_v8, %v1350_v45  ;;  %v1352_v7 = vpop.f32.mrb[37].mxu1 }
 0x1cf   : > { %v1435_v50 = vadd.f32 %v1421_v32, %v1419_v42  ;;  %v1989_v53 = vadd.f32 %v1326_v49, %v2710_v51  ;;  %v1328_v0 = vpop.f32.mrb[21].mxu0  ;;  %v2746_v2 = vadd.f32 %v2021_v23, %v1352_v7 }
 0x1d0   : > { %v1448_v17 = vadd.f32 %v1422_v6, %v1420_v25  ;;  %1389 = vst [vmem:[%s2484_s4 + $0x60] sm:$0xff] %v2741_v33  ;;  %v1992_v57 = vadd.f32 %v1328_v0, %v2712_v55 }
 0x1d1   : > { %1381 = vst [vmem:[%s2484_s4 + $0x20] sm:$0xff] %v1989_v53  ;;  %v1394_v60 = vadd.f32 %v1989_v53, %v1393_v44  ;;  %v1423_v61 = vmul.f32 %v1989_v53, %v1989_v53  ;;  %1390 = vst [vmem:[%s2484_s4 + $0x68] sm:$0xff] %v2746_v2  ;;  %v1356_v28 = vpop.f32.mrb[38].mxu1 }
 0x1d2   : > { %1382 = vst [vmem:[%s2484_s4 + $0x28] sm:$0xff] %v1992_v57  ;;  %v1407_v51 = vadd.f32 %v1992_v57, %v1406_v47  ;;  %v1424_v27 = vmul.f32 %v1992_v57, %v1992_v57  ;;  %v1332_v62 = vpop.f32.mrb[22].mxu0  ;;  %v2757_v1 = vadd.f32 %v2025_v58, %v1356_v28  ;;  %v1358_v20 = vpop.f32.mrb[39].mxu1 }
 0x1d3   : > { %v1436_v55 = vadd.f32 %v1435_v50, %v1423_v61  ;;  %v1995_v29 = vadd.f32 %v1332_v62, %v2714_v52  ;;  %v1334_v63 = vpop.f32.mrb[23].mxu0  ;;  %v2760_v3 = vadd.f32 %v2029_v19, %v1358_v20 }
 0x1d4   : > { %v1449_v11 = vadd.f32 %v1448_v17, %v1424_v27  ;;  %1391 = vst [vmem:[%s2484_s4 + $0x70] sm:$0xff] %v2757_v1  ;;  %v1998_v22 = vadd.f32 %v1334_v63, %v2716_v48 }
 0x1d5   : > { %1383 = vst [vmem:[%s2484_s4 + $0x30] sm:$0xff] %v1995_v29  ;;  %v1395_v52 = vadd.f32 %v1995_v29, %v1394_v60  ;;  %v1425_v18 = vmul.f32 %v1995_v29, %v1995_v29  ;;  %1392 = vst [vmem:[%s2484_s4 + $0x78] sm:$0xff] %v2760_v3 }
 0x1d6   : > { %1384 = vst [vmem:[%s2484_s4 + $0x38] sm:$0xff] %v1998_v22  ;;  %v1408_v4 = vadd.f32 %v1998_v22, %v1407_v51  ;;  %v1426_v13 = vmul.f32 %v1998_v22, %v1998_v22 }
 0x1d7   : > { %v1396_v5 = vadd.f32 %v2718_v21, %v1395_v52  ;;  %v1437_v48 = vadd.f32 %v1436_v55, %v1425_v18 }
 0x1d8   : > { %2194 = shalt.err (!%p2191_p6)
}
 0x1d9   : > { %s2195_s4 = scalar_lea.hbm %s2770_s24, 2048  ;;  %s2199_s21 = scalar_lea.hbm %s2888_s2, 16384 }
 0x1da   : > { %p2196_p7 = scmp.ne.s32.totalorder %s2770_s24, %s2195_s4  ;;  %p2200_p13 = scmp.lt.u32.totalorder %s2770_s24, %s2888_s2 }
 0x1db   : > { %p2201_p1 = scmp.lt.u32.totalorder %s2199_s21, %s2195_s4  ;;  %p2203_p3 = scmp.lt.u32.totalorder %s2195_s4, %s2770_s24 }
 0x1dc   : > { %p2197_p9 = pnand %p2196_p7, %p2901_p8 }
 0x1dd   : > { %p2202_p4 = por %p2201_p1, %p2200_p13 }
 0x1de   : > { %p2198_p11 = pneg %p2197_p9 }
 0x1df   : > { %p2204_p10 = por %p2203_p3, %p2202_p4 }
 0x1e1   : > { %p2205_p12 = pnand %p2204_p10, %p2198_p11 }
 0x1e3   : > { %2208 = shalt.err (!%p2205_p12)
}
 0x1e4   : > { %s2320_s25 = smov 256   ;;  %s2321_s6 = smov 16   ;;  %v1428_v14 = vmul.f32 %v2720_v30, %v2720_v30  ;;  %v1409_v8 = vadd.f32 %v2720_v30, %v1408_v4  ;;  %v1450_v23 = vadd.f32 %v1449_v11, %v1426_v13  ;;  %v1429_v9 = vmul.f32 %v2728_v46, %v2728_v46 }
 0x1e5   : > { %2059 = dma.vmem_to_hbm [thread:$0]  (%p2901_p8), %s2762_s8, 2048, %s2770_s24, %s1470_s30, %s2320_s25, %s2320_s25, %s2321_s6   ;;  %v1438_v56 = vadd.f32 %v1437_v48, %v1427_v38  ;;  %v1397_v10 = vadd.f32 %v2728_v46, %v1396_v5  ;;  %v1430_v40 = vmul.f32 %v2730_v12, %v2730_v12  ;;  %v1431_v58 = vmul.f32 %v2741_v33, %v2741_v33 }
 0x1e6   : > { %v1451_v15 = vadd.f32 %v1450_v23, %v1428_v14  ;;  %v1410_v16 = vadd.f32 %v2730_v12, %v1409_v8  ;;  %v1432_v54 = vmul.f32 %v2746_v2, %v2746_v2  ;;  %v1433_v59 = vmul.f32 %v2757_v1, %v2757_v1  ;;  %s1664_s8 = sshll.u32 %s2297_s15, 1  ;;  %s1665_s24 = sshll.u32 %s2301_s16, 3 }
 0x1e7   : > { %v1398_v19 = vadd.f32 %v2741_v33, %v1397_v10  ;;  %v1439_v39 = vadd.f32 %v1438_v56, %v1429_v9  ;;  %v1434_v43 = vmul.f32 %v2760_v3, %v2760_v3  ;;  %s1506_s30 = sadd.s32 %s1665_s24, %s1664_s8  ;;  %vm1461_vm2 = vcmask 1040384   ;;  %s1510_s9 = sshll.u32 %s2488_s29, 4  ;;  %s2832_s9 = int_to_ptr.vmem [resolvable:$true] %s1510_s9 }
 0x1e8   : > { %v1411_v21 = vadd.f32 %v2746_v2, %v1410_v16  ;;  %v1452_v24 = vadd.f32 %v1451_v15, %v1430_v40  ;;  %vm1464_vm3 = vcmask 1041408   ;;  %s1666_s15 = sshll.u32 %s1506_s30, 7  ;;  %s1475_s20 = scalar_lea.sflag [#allocation9], %s2453_s11 }
 0x1e9   : > { %v1399_v26 = vadd.f32 %v2757_v1, %v1398_v19  ;;  %v1440_v30 = vadd.f32 %v1439_v39, %v1431_v58  ;;  %s2830_s10 = scalar_lea.hbm %s2889_s3, %s1666_s15  ;;  %s2209_s21 = scalar_lea.vmem %s2832_s9, 256 }
 0x1ea   : > { %v1412_v31 = vadd.f32 %v2760_v3, %v1411_v21  ;;  %v1453_v34 = vadd.f32 %v1452_v24, %v1432_v54  ;;  %p2210_p0 = scmp.ne.s32.totalorder %s2832_s9, %s2209_s21  ;;  %s2322_s7 = smov [#allocation8]  }
 0x1eb   : > { %v1400_v46 = vrot.slane %v1399_v26, 4  ;;  %v1441_v36 = vadd.f32 %v1440_v30, %v1433_v59  ;;  %s2213_s28 = sshll.u32 %s2322_s7, 4  ;;  %s2214_s28 = int_to_ptr.vmem [resolvable:$false] %s2213_s28 }
 0x1ec   : > { %v1413_v35 = vrot.slane %v1412_v31, 4  ;;  %v1454_v37 = vadd.f32 %v1453_v34, %v1434_v43  ;;  %p2211_p2 = pnand %p2210_p0, %p2901_p8  ;;  %s2215_s25 = scalar_lea.vmem %s2214_s28, 512 }
 0x1ed   : > { %v1401_v12 = vadd.f32 %v1400_v46, %v1399_v26  ;;  %v1442_v41 = vrot.slane %v1441_v36, 4  ;;  %p2216_p6 = scmp.lt.s32.totalorder %s2832_s9, %s2214_s28  ;;  %p2217_p7 = scmp.lt.s32.totalorder %s2215_s25, %s2209_s21 }
 0x1ee   : > { %v1414_v42 = vadd.f32 %v1413_v35, %v1412_v31  ;;  %v1455_v44 = vrot.slane %v1454_v37, 4  ;;  %p2212_p5 = pneg %p2211_p2 }
 0x1ef   : > { %v1402_v32 = vrot.slane %v1401_v12, 2  ;;  %v1443_v45 = vadd.f32 %v1442_v41, %v1441_v36  ;;  %p2218_p9 = por %p2217_p7, %p2216_p6 }
 0x1f0   : > { %v1415_v25 = vrot.slane %v1414_v42, 2  ;;  %v1456_v47 = vadd.f32 %v1455_v44, %v1454_v37 }
 0x1f1   : > { %v1403_v6 = vadd.f32 %v1402_v32, %v1401_v12  ;;  %v1444_v49 = vrot.slane %v1443_v45, 2  ;;  %p2219_p11 = pnand %p2218_p9, %p2212_p5 }
 0x1f2   : > { %v1416_v33 = vadd.f32 %v1415_v25, %v1414_v42  ;;  %v1457_v7 = vrot.slane %v1456_v47, 2 }
 0x1f3   : > { %v1404_v50 = vrot.slane %v1403_v6, 1  ;;  %v1445_v53 = vadd.f32 %v1444_v49, %v1443_v45 }
 0x1f4   : > { %v1417_v0 = vrot.slane %v1416_v33, 1  ;;  %v1458_v2 = vadd.f32 %v1457_v7, %v1456_v47 }
 0x1f5   : > { %v1446_v17 = vrot.slane %v1445_v53, 1  ;;  %v1405_v60 = vadd.f32 %v1404_v50, %v1403_v6 }
 0x1f6   : > { %v1459_v57 = vrot.slane %v1458_v2, 1  ;;  %v1418_v28 = vadd.f32 %v1417_v0, %v1416_v33 }
 0x1f7   : > { %v1447_v61 = vadd.f32 %v1446_v17, %v1445_v53 }
 0x1f8   : > { %v1460_v51 = vadd.f32 %v1459_v57, %v1458_v2 }
 0x1f9   : > { %v1462_v27 = vsel %vm1461_vm2, %v1405_v60, %v1447_v61 }
 0x1fa   : > { %v1463_v62 = vsel %vm1461_vm2, %v1418_v28, %v1460_v51  ;;  %v1465_v1 = vsel %vm1464_vm3, %v1462_v27, 0.0 }
 0x1fb   : > { %v1466_v20 = vsel %vm1464_vm3, %v1463_v62, 0.0  ;;  %1467 = vst [vmem:[%s2488_s29] sm:$0xff] %v1465_v1 }
 0x1fc   : > { %1468 = vst [vmem:[%s2488_s29 + $0x8] sm:$0xff] %v1466_v20 }
 0x1fd   : > { %2222 = shalt.err (!%p2219_p11)
}
 0x1fe   : > { %s2223_s11 = scalar_lea.hbm %s2830_s10, 256  ;;  %s2227_s8 = scalar_lea.hbm %s2889_s3, 2048 }
 0x1ff   : > { %p2224_p13 = scmp.ne.s32.totalorder %s2830_s10, %s2223_s11  ;;  %p2228_p3 = scmp.lt.u32.totalorder %s2830_s10, %s2889_s3 }
 0x200   : > { %p2229_p10 = scmp.lt.u32.totalorder %s2227_s8, %s2223_s11  ;;  %p2231_p0 = scmp.lt.u32.totalorder %s2223_s11, %s2830_s10 }
 0x201   : > { %p2225_p1 = pnand %p2224_p13, %p2901_p8 }
 0x202   : > { %p2230_p12 = por %p2229_p10, %p2228_p3 }
 0x203   : > { %p2226_p4 = pneg %p2225_p1 }
 0x204   : > { %p2232_p2 = por %p2231_p0, %p2230_p12 }
 0x206   : > { %p2233_p5 = pnand %p2232_p2, %p2226_p4 }
 0x208   : > { %2236 = shalt.err (!%p2233_p5)
}
 0x209   : > { %2060 = dma.vmem_to_hbm [thread:$0]  (%p2901_p8), %s2832_s9, 256, %s2830_s10, %s1475_s20  }
 0x20a PF: > { %p2076_p6 = scmp.ge.s32.totalorder %s2313_s19, 2  ;;  %s1522_s15 = sand.u32 1, %s2285_s12  }
 0x20b   : > { %p2902_p7 = scmp.ne.s32.totalorder %s2895_s27, 0  ;;  %s1523_s16 = scalar_lea.sflag [#allocation6], %s1522_s15 }
 0x20d   : > { %p2068_p9 = pnand %p2076_p6, %p2902_p7 }
 0x20f   : > { %2276 = dma.done.wait (!%p2068_p9), %s1523_s16, 2048  }
 0x210   : > { %2278 = vsyncadd (!%p2068_p9), %s1523_s16, 4294965248  ;;  %s1532_s4 = scalar_lea.sflag [#allocation9], %s1522_s15 }
 0x211   : > { %2280 = dma.done.wait (!%p2068_p9), %s1532_s4, 256  }
 0x212   : > { %2282 = vsyncadd (!%p2068_p9), %s1532_s4, 4294967040  ;;  %s21_s19 = sadd.s32 1, %s2313_s19   ;;  %s2903_s12 = smov %s2289_s13 }
 0x213   : > { %p18_p11 = scmp.ge.s32.totalorder %s21_s19, 10   ;;  %s2904_s13 = smov %s2293_s14 }
 0x214   : > { %s2905_s14 = smov %s2422_s5  ;;  %s2906_s15 = smov %s2305_s17 }
 0x215   : > { %s2907_s16 = smov %s2309_s18  ;;  %s2908_s17 = smov %s2911_s22 }
 0x216   : > { %s2909_s18 = smov %s2915_s23  ;;  %20 = sbr.rel (!%p18_p11) target bundleno = 8 (0x8), region = 132 }
 0x21d   :  { %1537 = vsyncpa [#allocation5], 1 }
 0x21e   :  { %1539 = vsyncpa [#allocation5 + $0x1], 1 }
 0x21f   :  { %1540 = vsyncpa [#allocation6], 1 }
 0x220   :  { %1542 = vsyncpa [#allocation6 + $0x1], 1 }
 0x221   :  { %1543 = vsyncpa [#allocation9], 1 }
 0x222   :  { %1545 = vsyncpa [#allocation9 + $0x1], 1 }
 0x223   :  { %1546 = vsyncmov [#allocation3] }
 0x226   :  { %s1547_s26 = vpop.sfrf %1546 }
 0x227   :  { %p1669_p8 = scmp.ne.s32.totalorder %s1547_s26, 0 }
 0x229   :  { %1551 = shalt.err (%p1669_p8)  }

</bundles_post_ra>
